<compile_context>
chip_gen: v6e
topology: v6e:2x2x1
jax: 0.10.0
libtpu: 0.0.40
codegen_flags: <defaults>
</compile_context>

<pallas_src>
import functools

import jax
import jax.numpy as jnp
from jax.experimental import pallas as pl
from jax.experimental.pallas import tpu as pltpu


# ---------------- model config (small, consistent with BERT-style attention) ----------
B = 2          # batch
S = 8          # sequence length
H = 32         # hidden size
NUM_HEADS = 4
HEAD_DIM = H // NUM_HEADS
LN_EPS = 1e-12     # BERT default LayerNorm eps
NEG_INF = -1e9     # finite cross-batch mask value (never -inf -> never NaN)


# ---------------- Pallas kernel -------------------------------------------------------
def dual_bert_attention_kernel(h_ref, wqkv_ref, wout_ref, slab_ref, out_ref,
                               *, batch, seq, num_heads, head_dim):
    """Single-invocation kernel (grid=(1,)); everything lives in VMEM.

    h_ref    : (B*S, H)        hidden_states, flattened over batch+seq
    wqkv_ref : (H, 6H)         fused [br0 q|k|v, br1 q|k|v] weights, Q cols pre-scaled
    wout_ref : (2H, 2H)        block-diagonal [Wo0, 0; 0, Wo1] output weights
    slab_ref : (B*S+8, 256)    packed small operands:
                                 rows 0:B*S , cols 0:B*S  -> full additive mask
                                 row  B*S   , cols 0:6H   -> fused QKV biases
                                 row  B*S+1 , cols 0:2H   -> fused output biases
                                 rows B*S+2:B*S+6, 0:H    -> [gamma0, beta0, gamma1, beta1]
    out_ref  : (B*S, H)        output
    """
    hidden = num_heads * head_dim
    rows = batch * seq

    h = h_ref[...]                                                  # (rows, H) f32

    # Static slices of the packed parameter slab (all start at lane 0).
    mask = slab_ref[0:rows, 0:rows]                                 # (rows, rows)
    bqkv = slab_ref[rows:rows + 1, 0:6 * hidden]                    # (1, 6H)
    bout = slab_ref[rows + 1:rows + 2, 0:2 * hidden]                # (1, 2H)
    ln = slab_ref[rows + 2:rows + 6, 0:hidden]                      # (4, H)

    # --- fused QKV projection: one wide matmul for both branches (Q pre-scaled) ---
    qkv = jnp.dot(h, wqkv_ref[...],
                  preferred_element_type=jnp.float32) + bqkv        # (rows, 6H)

    # (2*NH, rows, HD) layout: batch folded into the matmul M dimension,
    # 8 static lane slices, no reshapes.
    def gather(kind):
        parts = []
        for br in range(2):
            base = br * 3 * hidden + kind * hidden
            for hd_i in range(num_heads):
                lo = base + hd_i * head_dim
                parts.append(qkv[:, lo:lo + head_dim][None])        # (1, rows, HD)
        return jnp.concatenate(parts, axis=0)                       # (2*NH, rows, HD)

    q_all = gather(0)
    k_all = gather(1)
    v_all = gather(2)

    # --- batched attention for both branches and all heads at once ---
    scores = jnp.einsum('bqd,bkd->bqk', q_all, k_all,
                        preferred_element_type=jnp.float32)         # (2*NH, rows, rows)
    scores = scores + mask[None]                                    # broadcast, no copies

    m = jnp.max(scores, axis=-1, keepdims=True)
    e = jnp.exp(scores - m)
    denom = jnp.sum(e, axis=-1, keepdims=True)
    r = pl.reciprocal(denom, approx=True)                           # EUP slot
    r = r * (2.0 - denom * r)                                       # one Newton refinement
    probs = e * r
    # (attention-prob dropout is identity in eval mode)

    ctx = jnp.einsum('bqk,bkd->bqd', probs, v_all,
                     preferred_element_type=jnp.float32)            # (2*NH, rows, HD)

    # Merge heads back into lanes: static leading-index slabs, no reshapes.
    def merge(br):
        return jnp.concatenate(
            [ctx[br * num_heads + i] for i in range(num_heads)], axis=-1)   # (rows, H)

    ctx_both = jnp.concatenate([merge(0), merge(1)], axis=-1)       # (rows, 2H)

    # --- fused BertSelfOutput dense layers (block-diagonal weight) ---
    proj = jnp.dot(ctx_both, wout_ref[...],
                   preferred_element_type=jnp.float32) + bout       # (rows, 2H)

    # --- per-branch LayerNorm(proj + residual), summed, then ReLU ---
    acc = jnp.zeros_like(h)
    for br in range(2):
        x = proj[:, br * hidden:(br + 1) * hidden] + h
        mu = jnp.mean(x, axis=-1, keepdims=True)
        var = jnp.mean((x - mu) * (x - mu), axis=-1, keepdims=True)
        xn = (x - mu) * jax.lax.rsqrt(var + LN_EPS)
        acc = acc + xn * ln[2 * br:2 * br + 1, :] + ln[2 * br + 1:2 * br + 2, :]

    out_ref[...] = jnp.maximum(acc, 0.0)                            # ReLU(sum), single store


# ---------------- wrapper --------------------------------------------------------------
def dual_bert_attention(hidden_states, attention_mask, weights, biases, ln_params):
    """hidden_states: (B, S, H) f32; attention_mask: (B, 1, S) additive f32.

    weights : (2, 4, H, H)   [branch, {q,k,v,out}] (in, out)
    biases  : (2, 4, 1, H)
    ln_params: (2, 2, 1, H)  [branch, {gamma, beta}]
    """
    b, s, hdim = hidden_states.shape
    nh = NUM_HEADS
    hd = hdim // nh
    rows = b * s
    scale = 1.0 / (hd ** 0.5)

    # --- one-time wrapper-side parameter packing (plain XLA, outside the kernel) ---
    # Fused QKV weights/biases with 1/sqrt(head_dim) folded into the Q columns.
    w_parts, b_parts = [], []
    for br in range(2):
        w_parts += [weights[br, 0] * scale, weights[br, 1], weights[br, 2]]
        b_parts += [biases[br, 0].reshape(1, hdim) * scale,
                    biases[br, 1].reshape(1, hdim),
                    biases[br, 2].reshape(1, hdim)]
    w_qkv = jnp.concatenate(w_parts, axis=1)                                   # (H, 6H)
    b_qkv = jnp.concatenate(b_parts, axis=1)                                   # (1, 6H)

    zeros = jnp.zeros((hdim, hdim), weights.dtype)
    w_out = jnp.concatenate(
        [jnp.concatenate([weights[0, 3], zeros], axis=1),
         jnp.concatenate([zeros, weights[1, 3]], axis=1)], axis=0)             # (2H, 2H)
    b_out = jnp.concatenate([biases[0, 3].reshape(1, hdim),
                             biases[1, 3].reshape(1, hdim)], axis=1)           # (1, 2H)
    ln_rows = jnp.concatenate([ln_params[0, 0].reshape(1, hdim),
                               ln_params[0, 1].reshape(1, hdim),
                               ln_params[1, 0].reshape(1, hdim),
                               ln_params[1, 1].reshape(1, hdim)], axis=0)      # (4, H)

    # Full (rows, rows) additive mask: per-key attention mask on in-batch entries,
    # large finite negative on cross-batch entries (exp underflows to exactly 0).
    flat_b = jnp.arange(rows) // s
    same_batch = flat_b[:, None] == flat_b[None, :]
    key_mask = attention_mask[:, 0, :].reshape(rows)
    full_mask = jnp.where(same_batch, key_mask[None, :], NEG_INF)              # (rows, rows)

    # Single lane-dense parameter slab: mask + biases + LN params -> one DMA.
    slab = jnp.zeros((rows + 8, 256), jnp.float32)
    slab = slab.at[0:rows, 0:rows].set(full_mask)
    slab = slab.at[rows, 0:6 * hdim].set(b_qkv.reshape(-1))
    slab = slab.at[rows + 1, 0:2 * hdim].set(b_out.reshape(-1))
    slab = slab.at[rows + 2:rows + 6, 0:hdim].set(ln_rows)

    h2d = hidden_states.reshape(rows, hdim)

    kernel = functools.partial(dual_bert_attention_kernel,
                               batch=b, seq=s, num_heads=nh, head_dim=hd)

    out2d = pl.pallas_call(
        kernel,
        out_shape=jax.ShapeDtypeStruct((rows, hdim), jnp.float32),
        grid_spec=pltpu.PrefetchScalarGridSpec(
            num_scalar_prefetch=0,
            grid=(1,),                                       # whole problem in one step
            in_specs=[
                pl.BlockSpec((rows, hdim), lambda i: (0, 0)),            # hidden (flat)
                pl.BlockSpec((hdim, 6 * hdim), lambda i: (0, 0)),        # fused QKV W
                pl.BlockSpec((2 * hdim, 2 * hdim), lambda i: (0, 0)),    # block-diag out W
                pl.BlockSpec((rows + 8, 256), lambda i: (0, 0)),         # packed param slab
            ],
            out_specs=pl.BlockSpec((rows, hdim), lambda i: (0, 0)),
        ),
        compiler_params=pltpu.CompilerParams(
            dimension_semantics=("arbitrary",)),
    )(h2d, w_qkv, w_out, slab)

    return out2d.reshape(b, s, hdim)


# ---------------- pure-JAX reference (for verification) --------------------------------
def reference(hidden_states, attention_mask, weights, biases, ln_params):
    scale = 1.0 / (HEAD_DIM ** 0.5)
    h = hidden_states
    acc = jnp.zeros_like(h)
    for br in range(2):
        q = h @ weights[br, 0] + biases[br, 0, 0]
        k = h @ weights[br, 1] + biases[br, 1, 0]
        v = h @ weights[br, 2] + biases[br, 2, 0]

        def split(x):  # (B, S, H) -> (B, nh, S, hd)
            return x.reshape(B, S, NUM_HEADS, HEAD_DIM).transpose(0, 2, 1, 3)

        qh, kh, vh = split(q), split(k), split(v)
        scores = jnp.einsum("bnqd,bnkd->bnqk", qh, kh) * scale
        scores = scores + attention_mask[:, None, :, :]   # (B,1,1,S) broadcast
        probs = jax.nn.softmax(scores, axis=-1)
        ctx = jnp.einsum("bnqk,bnkd->bnqd", probs, vh)
        ctx = ctx.transpose(0, 2, 1, 3).reshape(B, S, H)

        proj = ctx @ weights[br, 3] + biases[br, 3, 0]
        x = proj + h
        mu = jnp.mean(x, axis=-1, keepdims=True)
        var = jnp.mean((x - mu) ** 2, axis=-1, keepdims=True)
        y = (x - mu) / jnp.sqrt(var + LN_EPS) * ln_params[br, 0, 0] + ln_params[br, 1, 0]
        acc = acc + y
    return jnp.maximum(acc, 0.0)


# ---------------- main ------------------------------------------------------------------
if __name__ == "__main__":
    key = jax.random.PRNGKey(0)
    k_h, k_w, k_b, k_ln = jax.random.split(key, 4)

    hidden_states = jax.random.normal(k_h, (B, S, H), jnp.float32)
    # Additive attention mask (0 = attend). Shape (B, 1, S).
    attention_mask = jnp.zeros((B, 1, S), jnp.float32)

    # Deterministic synthetic parameters.
    weights = 0.02 * jax.random.normal(k_w, (2, 4, H, H), jnp.float32)   # [branch,{q,k,v,o}]
    biases = 0.01 * jax.random.normal(k_b, (2, 4, 1, H), jnp.float32)
    gamma = jnp.ones((2, 1, 1, H), jnp.float32) + 0.05 * jax.random.normal(
        k_ln, (2, 1, 1, H), jnp.float32)
    beta = jnp.zeros((2, 1, 1, H), jnp.float32)
    ln_params = jnp.concatenate([gamma, beta], axis=1)                    # (2, 2, 1, H)

    out = dual_bert_attention(hidden_states, attention_mask, weights, biases, ln_params)
    out = jax.block_until_ready(out)

    ref = reference(hidden_states, attention_mask, weights, biases, ln_params)
    assert out.shape == (B, S, H)
    assert jnp.max(jnp.abs(out - ref)) < 1e-4, "mismatch vs pure-JAX reference"

    print("KERNEL_OK")
</pallas_src>

<mosaic_0001>
module attributes {stable_mosaic.version = 11 : i64} {
  func.func @dual_bert_attention_kernel(%arg0: i32, %arg1: memref<16x32xf32, #tpu.memory_space<vmem>>, %arg2: memref<32x192xf32, #tpu.memory_space<vmem>>, %arg3: memref<64x64xf32, #tpu.memory_space<vmem>>, %arg4: memref<24x256xf32, #tpu.memory_space<vmem>>, %arg5: memref<16x32xf32, #tpu.memory_space<vmem>>) attributes {dimension_semantics = [#tpu.dimension_semantics<arbitrary>], iteration_bounds = array<i64: 1>, scalar_prefetch = 0 : i64, scratch_operands = 0 : i64, tpu.core_type = #tpu.core_type<tc>, window_params = [{pipeline_mode = #tpu.pipeline_mode<synchronous>, transform_indices = @transform_0, window_bounds = array<i64: 16, 32>}, {pipeline_mode = #tpu.pipeline_mode<synchronous>, transform_indices = @transform_1, window_bounds = array<i64: 32, 192>}, {pipeline_mode = #tpu.pipeline_mode<synchronous>, transform_indices = @transform_2, window_bounds = array<i64: 64, 64>}, {pipeline_mode = #tpu.pipeline_mode<synchronous>, transform_indices = @transform_3, window_bounds = array<i64: 24, 256>}, {pipeline_mode = #tpu.pipeline_mode<synchronous>, transform_indices = @transform_4, window_bounds = array<i64: 16, 32>}]} {
    %c0 = arith.constant 0 : index
    %c0_0 = arith.constant 0 : index
    %0 = vector.load %arg1[%c0, %c0_0] : memref<16x32xf32, #tpu.memory_space<vmem>>, vector<16x32xf32>
    %c0_1 = arith.constant 0 : index
    %c0_2 = arith.constant 0 : index
    %1 = vector.load %arg4[%c0_1, %c0_2] : memref<24x256xf32, #tpu.memory_space<vmem>>, vector<16x16xf32>
    %c16 = arith.constant 16 : index
    %c0_3 = arith.constant 0 : index
    %2 = vector.load %arg4[%c16, %c0_3] : memref<24x256xf32, #tpu.memory_space<vmem>>, vector<1x192xf32>
    %c17 = arith.constant 17 : index
    %c0_4 = arith.constant 0 : index
    %3 = vector.load %arg4[%c17, %c0_4] : memref<24x256xf32, #tpu.memory_space<vmem>>, vector<1x64xf32>
    %c18 = arith.constant 18 : index
    %c0_5 = arith.constant 0 : index
    %4 = vector.load %arg4[%c18, %c0_5] : memref<24x256xf32, #tpu.memory_space<vmem>>, vector<4x32xf32>
    %c0_6 = arith.constant 0 : index
    %c0_7 = arith.constant 0 : index
    %5 = vector.load %arg2[%c0_6, %c0_7] : memref<32x192xf32, #tpu.memory_space<vmem>>, vector<32x192xf32>
    %cst = arith.constant dense<0.000000e+00> : vector<16x192xf32>
    %6 = tpu.matmul %0, %5, %cst {dimension_numbers = #tpu.dot_dimension_numbers<[1], [0], [0], [1], [0, 0, 1, 1], [], []>} : vector<16x32xf32>, vector<32x192xf32>, vector<16x192xf32> -> vector<16x192xf32>
    %7 = vector.broadcast %2 : vector<1x192xf32> to vector<16x192xf32>
    %8 = arith.addf %6, %7 : vector<16x192xf32>
    %9 = vector.extract_strided_slice %8 {offsets = [0, 0], sizes = [16, 8], strides = [1, 1]} : vector<16x192xf32> to vector<16x8xf32>
    %10 = vector.shape_cast %9 : vector<16x8xf32> to vector<1x16x8xf32>
    %11 = vector.extract_strided_slice %8 {offsets = [0, 8], sizes = [16, 8], strides = [1, 1]} : vector<16x192xf32> to vector<16x8xf32>
    %12 = vector.shape_cast %11 : vector<16x8xf32> to vector<1x16x8xf32>
    %13 = vector.extract_strided_slice %8 {offsets = [0, 16], sizes = [16, 8], strides = [1, 1]} : vector<16x192xf32> to vector<16x8xf32>
    %14 = vector.shape_cast %13 : vector<16x8xf32> to vector<1x16x8xf32>
    %15 = vector.extract_strided_slice %8 {offsets = [0, 24], sizes = [16, 8], strides = [1, 1]} : vector<16x192xf32> to vector<16x8xf32>
    %16 = vector.shape_cast %15 : vector<16x8xf32> to vector<1x16x8xf32>
    %17 = vector.extract_strided_slice %8 {offsets = [0, 96], sizes = [16, 8], strides = [1, 1]} : vector<16x192xf32> to vector<16x8xf32>
    %18 = vector.shape_cast %17 : vector<16x8xf32> to vector<1x16x8xf32>
    %19 = vector.extract_strided_slice %8 {offsets = [0, 104], sizes = [16, 8], strides = [1, 1]} : vector<16x192xf32> to vector<16x8xf32>
    %20 = vector.shape_cast %19 : vector<16x8xf32> to vector<1x16x8xf32>
    %21 = vector.extract_strided_slice %8 {offsets = [0, 112], sizes = [16, 8], strides = [1, 1]} : vector<16x192xf32> to vector<16x8xf32>
    %22 = vector.shape_cast %21 : vector<16x8xf32> to vector<1x16x8xf32>
    %23 = vector.extract_strided_slice %8 {offsets = [0, 120], sizes = [16, 8], strides = [1, 1]} : vector<16x192xf32> to vector<16x8xf32>
    %24 = vector.shape_cast %23 : vector<16x8xf32> to vector<1x16x8xf32>
    %25 = tpu.concatenate %10, %12, %14, %16, %18, %20, %22, %24 in 0 : vector<1x16x8xf32>, vector<1x16x8xf32>, vector<1x16x8xf32>, vector<1x16x8xf32>, vector<1x16x8xf32>, vector<1x16x8xf32>, vector<1x16x8xf32>, vector<1x16x8xf32> -> vector<8x16x8xf32>
    %26 = vector.extract_strided_slice %8 {offsets = [0, 32], sizes = [16, 8], strides = [1, 1]} : vector<16x192xf32> to vector<16x8xf32>
    %27 = vector.shape_cast %26 : vector<16x8xf32> to vector<1x16x8xf32>
    %28 = vector.extract_strided_slice %8 {offsets = [0, 40], sizes = [16, 8], strides = [1, 1]} : vector<16x192xf32> to vector<16x8xf32>
    %29 = vector.shape_cast %28 : vector<16x8xf32> to vector<1x16x8xf32>
    %30 = vector.extract_strided_slice %8 {offsets = [0, 48], sizes = [16, 8], strides = [1, 1]} : vector<16x192xf32> to vector<16x8xf32>
    %31 = vector.shape_cast %30 : vector<16x8xf32> to vector<1x16x8xf32>
    %32 = vector.extract_strided_slice %8 {offsets = [0, 56], sizes = [16, 8], strides = [1, 1]} : vector<16x192xf32> to vector<16x8xf32>
    %33 = vector.shape_cast %32 : vector<16x8xf32> to vector<1x16x8xf32>
    %34 = vector.extract_strided_slice %8 {offsets = [0, 128], sizes = [16, 8], strides = [1, 1]} : vector<16x192xf32> to vector<16x8xf32>
    %35 = vector.shape_cast %34 : vector<16x8xf32> to vector<1x16x8xf32>
    %36 = vector.extract_strided_slice %8 {offsets = [0, 136], sizes = [16, 8], strides = [1, 1]} : vector<16x192xf32> to vector<16x8xf32>
    %37 = vector.shape_cast %36 : vector<16x8xf32> to vector<1x16x8xf32>
    %38 = vector.extract_strided_slice %8 {offsets = [0, 144], sizes = [16, 8], strides = [1, 1]} : vector<16x192xf32> to vector<16x8xf32>
    %39 = vector.shape_cast %38 : vector<16x8xf32> to vector<1x16x8xf32>
    %40 = vector.extract_strided_slice %8 {offsets = [0, 152], sizes = [16, 8], strides = [1, 1]} : vector<16x192xf32> to vector<16x8xf32>
    %41 = vector.shape_cast %40 : vector<16x8xf32> to vector<1x16x8xf32>
    %42 = tpu.concatenate %27, %29, %31, %33, %35, %37, %39, %41 in 0 : vector<1x16x8xf32>, vector<1x16x8xf32>, vector<1x16x8xf32>, vector<1x16x8xf32>, vector<1x16x8xf32>, vector<1x16x8xf32>, vector<1x16x8xf32>, vector<1x16x8xf32> -> vector<8x16x8xf32>
    %43 = vector.extract_strided_slice %8 {offsets = [0, 64], sizes = [16, 8], strides = [1, 1]} : vector<16x192xf32> to vector<16x8xf32>
    %44 = vector.shape_cast %43 : vector<16x8xf32> to vector<1x16x8xf32>
    %45 = vector.extract_strided_slice %8 {offsets = [0, 72], sizes = [16, 8], strides = [1, 1]} : vector<16x192xf32> to vector<16x8xf32>
    %46 = vector.shape_cast %45 : vector<16x8xf32> to vector<1x16x8xf32>
    %47 = vector.extract_strided_slice %8 {offsets = [0, 80], sizes = [16, 8], strides = [1, 1]} : vector<16x192xf32> to vector<16x8xf32>
    %48 = vector.shape_cast %47 : vector<16x8xf32> to vector<1x16x8xf32>
    %49 = vector.extract_strided_slice %8 {offsets = [0, 88], sizes = [16, 8], strides = [1, 1]} : vector<16x192xf32> to vector<16x8xf32>
    %50 = vector.shape_cast %49 : vector<16x8xf32> to vector<1x16x8xf32>
    %51 = vector.extract_strided_slice %8 {offsets = [0, 160], sizes = [16, 8], strides = [1, 1]} : vector<16x192xf32> to vector<16x8xf32>
    %52 = vector.shape_cast %51 : vector<16x8xf32> to vector<1x16x8xf32>
    %53 = vector.extract_strided_slice %8 {offsets = [0, 168], sizes = [16, 8], strides = [1, 1]} : vector<16x192xf32> to vector<16x8xf32>
    %54 = vector.shape_cast %53 : vector<16x8xf32> to vector<1x16x8xf32>
    %55 = vector.extract_strided_slice %8 {offsets = [0, 176], sizes = [16, 8], strides = [1, 1]} : vector<16x192xf32> to vector<16x8xf32>
    %56 = vector.shape_cast %55 : vector<16x8xf32> to vector<1x16x8xf32>
    %57 = vector.extract_strided_slice %8 {offsets = [0, 184], sizes = [16, 8], strides = [1, 1]} : vector<16x192xf32> to vector<16x8xf32>
    %58 = vector.shape_cast %57 : vector<16x8xf32> to vector<1x16x8xf32>
    %59 = tpu.concatenate %44, %46, %48, %50, %52, %54, %56, %58 in 0 : vector<1x16x8xf32>, vector<1x16x8xf32>, vector<1x16x8xf32>, vector<1x16x8xf32>, vector<1x16x8xf32>, vector<1x16x8xf32>, vector<1x16x8xf32>, vector<1x16x8xf32> -> vector<8x16x8xf32>
    "tpu.trace_start"() <{level = 10 : i32, message = "bqd,bkd->bqk"}> : () -> ()
    %cst_8 = arith.constant dense<0.000000e+00> : vector<8x16x16xf32>
    %60 = tpu.matmul %25, %42, %cst_8 {dimension_numbers = #tpu.dot_dimension_numbers<[2], [2], [1], [1], [0, 0, 0, 1, 1, 1], [0], [0]>} : vector<8x16x8xf32>, vector<8x16x8xf32>, vector<8x16x16xf32> -> vector<8x16x16xf32>
    "tpu.trace_stop"() : () -> ()
    %61 = vector.shape_cast %1 : vector<16x16xf32> to vector<1x16x16xf32>
    %62 = vector.broadcast %61 : vector<1x16x16xf32> to vector<8x16x16xf32>
    %63 = arith.addf %60, %62 : vector<8x16x16xf32>
    %cst_9 = arith.constant dense<0xFF800000> : vector<8x16xf32>
    %64 = vector.multi_reduction <maximumf>, %63, %cst_9 [2] : vector<8x16x16xf32> to vector<8x16xf32>
    %65 = vector.shape_cast %64 : vector<8x16xf32> to vector<8x16x1xf32>
    %66 = vector.broadcast %65 : vector<8x16x1xf32> to vector<8x16x16xf32>
    %67 = arith.subf %63, %66 : vector<8x16x16xf32>
    %68 = math.exp %67 : vector<8x16x16xf32>
    %cst_10 = arith.constant dense<0.000000e+00> : vector<8x16xf32>
    %69 = vector.multi_reduction <add>, %68, %cst_10 [2] : vector<8x16x16xf32> to vector<8x16xf32>
    %70 = vector.shape_cast %69 : vector<8x16xf32> to vector<8x16x1xf32>
    %71 = tpu.reciprocal %70 {approx = true} : vector<8x16x1xf32> -> vector<8x16x1xf32>
    %72 = arith.mulf %70, %71 : vector<8x16x1xf32>
    %cst_11 = arith.constant 2.000000e+00 : f32
    %73 = vector.broadcast %cst_11 : f32 to vector<8x16x1xf32>
    %74 = arith.subf %73, %72 : vector<8x16x1xf32>
    %75 = arith.mulf %71, %74 : vector<8x16x1xf32>
    %76 = vector.broadcast %75 : vector<8x16x1xf32> to vector<8x16x16xf32>
    %77 = arith.mulf %68, %76 : vector<8x16x16xf32>
    "tpu.trace_start"() <{level = 10 : i32, message = "bqk,bkd->bqd"}> : () -> ()
    %cst_12 = arith.constant dense<0.000000e+00> : vector<8x16x8xf32>
    %78 = tpu.matmul %77, %59, %cst_12 {dimension_numbers = #tpu.dot_dimension_numbers<[2], [1], [1], [2], [0, 0, 0, 1, 1, 2], [0], [0]>} : vector<8x16x16xf32>, vector<8x16x8xf32>, vector<8x16x8xf32> -> vector<8x16x8xf32>
    "tpu.trace_stop"() : () -> ()
    %79 = vector.extract_strided_slice %78 {offsets = [0, 0, 0], sizes = [1, 16, 8], strides = [1, 1, 1]} : vector<8x16x8xf32> to vector<1x16x8xf32>
    %80 = vector.shape_cast %79 : vector<1x16x8xf32> to vector<16x8xf32>
    %81 = vector.extract_strided_slice %78 {offsets = [1, 0, 0], sizes = [1, 16, 8], strides = [1, 1, 1]} : vector<8x16x8xf32> to vector<1x16x8xf32>
    %82 = vector.shape_cast %81 : vector<1x16x8xf32> to vector<16x8xf32>
    %83 = vector.extract_strided_slice %78 {offsets = [2, 0, 0], sizes = [1, 16, 8], strides = [1, 1, 1]} : vector<8x16x8xf32> to vector<1x16x8xf32>
    %84 = vector.shape_cast %83 : vector<1x16x8xf32> to vector<16x8xf32>
    %85 = vector.extract_strided_slice %78 {offsets = [3, 0, 0], sizes = [1, 16, 8], strides = [1, 1, 1]} : vector<8x16x8xf32> to vector<1x16x8xf32>
    %86 = vector.shape_cast %85 : vector<1x16x8xf32> to vector<16x8xf32>
    %87 = tpu.concatenate %80, %82, %84, %86 in 1 : vector<16x8xf32>, vector<16x8xf32>, vector<16x8xf32>, vector<16x8xf32> -> vector<16x32xf32>
    %88 = vector.extract_strided_slice %78 {offsets = [4, 0, 0], sizes = [1, 16, 8], strides = [1, 1, 1]} : vector<8x16x8xf32> to vector<1x16x8xf32>
    %89 = vector.shape_cast %88 : vector<1x16x8xf32> to vector<16x8xf32>
    %90 = vector.extract_strided_slice %78 {offsets = [5, 0, 0], sizes = [1, 16, 8], strides = [1, 1, 1]} : vector<8x16x8xf32> to vector<1x16x8xf32>
    %91 = vector.shape_cast %90 : vector<1x16x8xf32> to vector<16x8xf32>
    %92 = vector.extract_strided_slice %78 {offsets = [6, 0, 0], sizes = [1, 16, 8], strides = [1, 1, 1]} : vector<8x16x8xf32> to vector<1x16x8xf32>
    %93 = vector.shape_cast %92 : vector<1x16x8xf32> to vector<16x8xf32>
    %94 = vector.extract_strided_slice %78 {offsets = [7, 0, 0], sizes = [1, 16, 8], strides = [1, 1, 1]} : vector<8x16x8xf32> to vector<1x16x8xf32>
    %95 = vector.shape_cast %94 : vector<1x16x8xf32> to vector<16x8xf32>
    %96 = tpu.concatenate %89, %91, %93, %95 in 1 : vector<16x8xf32>, vector<16x8xf32>, vector<16x8xf32>, vector<16x8xf32> -> vector<16x32xf32>
    %97 = tpu.concatenate %87, %96 in 1 : vector<16x32xf32>, vector<16x32xf32> -> vector<16x64xf32>
    %c0_13 = arith.constant 0 : index
    %c0_14 = arith.constant 0 : index
    %98 = vector.load %arg3[%c0_13, %c0_14] : memref<64x64xf32, #tpu.memory_space<vmem>>, vector<64x64xf32>
    %cst_15 = arith.constant dense<0.000000e+00> : vector<16x64xf32>
    %99 = tpu.matmul %97, %98, %cst_15 {dimension_numbers = #tpu.dot_dimension_numbers<[1], [0], [0], [1], [0, 0, 1, 1], [], []>} : vector<16x64xf32>, vector<64x64xf32>, vector<16x64xf32> -> vector<16x64xf32>
    %100 = vector.broadcast %3 : vector<1x64xf32> to vector<16x64xf32>
    %101 = arith.addf %99, %100 : vector<16x64xf32>
    %cst_16 = arith.constant 0.000000e+00 : f32
    %102 = vector.broadcast %cst_16 : f32 to vector<16x32xf32>
    %103 = vector.extract_strided_slice %101 {offsets = [0, 0], sizes = [16, 32], strides = [1, 1]} : vector<16x64xf32> to vector<16x32xf32>
    %104 = arith.addf %103, %0 : vector<16x32xf32>
    %cst_17 = arith.constant dense<0.000000e+00> : vector<16xf32>
    %105 = vector.multi_reduction <add>, %104, %cst_17 [1] : vector<16x32xf32> to vector<16xf32>
    %106 = vector.shape_cast %105 : vector<16xf32> to vector<16x1xf32>
    %cst_18 = arith.constant 3.200000e+01 : f32
    %107 = vector.broadcast %cst_18 : f32 to vector<16x1xf32>
    %108 = arith.divf %106, %107 : vector<16x1xf32>
    %109 = vector.broadcast %108 : vector<16x1xf32> to vector<16x32xf32>
    %110 = arith.subf %104, %109 : vector<16x32xf32>
    %111 = vector.broadcast %108 : vector<16x1xf32> to vector<16x32xf32>
    %112 = arith.subf %104, %111 : vector<16x32xf32>
    %113 = arith.mulf %110, %112 : vector<16x32xf32>
    %cst_19 = arith.constant dense<0.000000e+00> : vector<16xf32>
    %114 = vector.multi_reduction <add>, %113, %cst_19 [1] : vector<16x32xf32> to vector<16xf32>
    %115 = vector.shape_cast %114 : vector<16xf32> to vector<16x1xf32>
    %cst_20 = arith.constant 3.200000e+01 : f32
    %116 = vector.broadcast %cst_20 : f32 to vector<16x1xf32>
    %117 = arith.divf %115, %116 : vector<16x1xf32>
    %118 = vector.broadcast %108 : vector<16x1xf32> to vector<16x32xf32>
    %119 = arith.subf %104, %118 : vector<16x32xf32>
    %cst_21 = arith.constant 9.99999996E-13 : f32
    %120 = vector.broadcast %cst_21 : f32 to vector<16x1xf32>
    %121 = arith.addf %117, %120 : vector<16x1xf32>
    %122 = math.rsqrt %121 : vector<16x1xf32>
    %123 = vector.broadcast %122 : vector<16x1xf32> to vector<16x32xf32>
    %124 = arith.mulf %119, %123 : vector<16x32xf32>
    %125 = vector.extract_strided_slice %4 {offsets = [0, 0], sizes = [1, 32], strides = [1, 1]} : vector<4x32xf32> to vector<1x32xf32>
    %126 = vector.broadcast %125 : vector<1x32xf32> to vector<16x32xf32>
    %127 = arith.mulf %124, %126 : vector<16x32xf32>
    %128 = arith.addf %102, %127 : vector<16x32xf32>
    %129 = vector.extract_strided_slice %4 {offsets = [1, 0], sizes = [1, 32], strides = [1, 1]} : vector<4x32xf32> to vector<1x32xf32>
    %130 = vector.broadcast %129 : vector<1x32xf32> to vector<16x32xf32>
    %131 = arith.addf %128, %130 : vector<16x32xf32>
    %132 = vector.extract_strided_slice %101 {offsets = [0, 32], sizes = [16, 32], strides = [1, 1]} : vector<16x64xf32> to vector<16x32xf32>
    %133 = arith.addf %132, %0 : vector<16x32xf32>
    %cst_22 = arith.constant dense<0.000000e+00> : vector<16xf32>
    %134 = vector.multi_reduction <add>, %133, %cst_22 [1] : vector<16x32xf32> to vector<16xf32>
    %135 = vector.shape_cast %134 : vector<16xf32> to vector<16x1xf32>
    %cst_23 = arith.constant 3.200000e+01 : f32
    %136 = vector.broadcast %cst_23 : f32 to vector<16x1xf32>
    %137 = arith.divf %135, %136 : vector<16x1xf32>
    %138 = vector.broadcast %137 : vector<16x1xf32> to vector<16x32xf32>
    %139 = arith.subf %133, %138 : vector<16x32xf32>
    %140 = vector.broadcast %137 : vector<16x1xf32> to vector<16x32xf32>
    %141 = arith.subf %133, %140 : vector<16x32xf32>
    %142 = arith.mulf %139, %141 : vector<16x32xf32>
    %cst_24 = arith.constant dense<0.000000e+00> : vector<16xf32>
    %143 = vector.multi_reduction <add>, %142, %cst_24 [1] : vector<16x32xf32> to vector<16xf32>
    %144 = vector.shape_cast %143 : vector<16xf32> to vector<16x1xf32>
    %cst_25 = arith.constant 3.200000e+01 : f32
    %145 = vector.broadcast %cst_25 : f32 to vector<16x1xf32>
    %146 = arith.divf %144, %145 : vector<16x1xf32>
    %147 = vector.broadcast %137 : vector<16x1xf32> to vector<16x32xf32>
    %148 = arith.subf %133, %147 : vector<16x32xf32>
    %cst_26 = arith.constant 9.99999996E-13 : f32
    %149 = vector.broadcast %cst_26 : f32 to vector<16x1xf32>
    %150 = arith.addf %146, %149 : vector<16x1xf32>
    %151 = math.rsqrt %150 : vector<16x1xf32>
    %152 = vector.broadcast %151 : vector<16x1xf32> to vector<16x32xf32>
    %153 = arith.mulf %148, %152 : vector<16x32xf32>
    %154 = vector.extract_strided_slice %4 {offsets = [2, 0], sizes = [1, 32], strides = [1, 1]} : vector<4x32xf32> to vector<1x32xf32>
    %155 = vector.broadcast %154 : vector<1x32xf32> to vector<16x32xf32>
    %156 = arith.mulf %153, %155 : vector<16x32xf32>
    %157 = arith.addf %131, %156 : vector<16x32xf32>
    %158 = vector.extract_strided_slice %4 {offsets = [3, 0], sizes = [1, 32], strides = [1, 1]} : vector<4x32xf32> to vector<1x32xf32>
    %159 = vector.broadcast %158 : vector<1x32xf32> to vector<16x32xf32>
    %160 = arith.addf %157, %159 : vector<16x32xf32>
    %cst_27 = arith.constant 0.000000e+00 : f32
    %161 = vector.broadcast %cst_27 : f32 to vector<16x32xf32>
    %162 = arith.maximumf %160, %161 : vector<16x32xf32>
    %c0_28 = arith.constant 0 : index
    %c0_29 = arith.constant 0 : index
    %163 = vector.load %arg5[%c0_28, %c0_29] : memref<16x32xf32, #tpu.memory_space<vmem>>, vector<16x32xf32>
    tpu.vector_store %arg5[%c0_28, %c0_29], %162 {strides = array<i32>} : memref<16x32xf32, #tpu.memory_space<vmem>>, vector<16x32xf32>,
    return
  }
  func.func @transform_0(%arg0: i32) -> (i32, i32) {
    %c0_i32 = arith.constant 0 : i32
    %c0_i32_0 = arith.constant 0 : i32
    %c0_i32_1 = arith.constant 0 : i32
    return %c0_i32, %c0_i32_0 : i32, i32
  }
  func.func @transform_1(%arg0: i32) -> (i32, i32) {
    %c0_i32 = arith.constant 0 : i32
    %c0_i32_0 = arith.constant 0 : i32
    %c0_i32_1 = arith.constant 0 : i32
    return %c0_i32, %c0_i32_0 : i32, i32
  }
  func.func @transform_2(%arg0: i32) -> (i32, i32) {
    %c0_i32 = arith.constant 0 : i32
    %c0_i32_0 = arith.constant 0 : i32
    %c0_i32_1 = arith.constant 0 : i32
    return %c0_i32, %c0_i32_0 : i32, i32
  }
  func.func @transform_3(%arg0: i32) -> (i32, i32) {
    %c0_i32 = arith.constant 0 : i32
    %c0_i32_0 = arith.constant 0 : i32
    %c0_i32_1 = arith.constant 0 : i32
    return %c0_i32, %c0_i32_0 : i32, i32
  }
  func.func @transform_4(%arg0: i32) -> (i32, i32) {
    %c0_i32 = arith.constant 0 : i32
    %c0_i32_0 = arith.constant 0 : i32
    %c0_i32_1 = arith.constant 0 : i32
    return %c0_i32, %c0_i32_0 : i32, i32
  }
}

</mosaic_0001>

<bundles_post_ra>
// kernel: tpu_custom_call.1
= control target key start
LH: loop header
LB: loop body
LE: loop exit
PB: predicated region body
PF: predicated region fallthrough
CT: control target
= control target key end

     0   :  { %9 = vsyncpa [#allocation3], 0  ;;  %s3132_s0 = inlined_call_operand.hbm [shape: f32[16,32], index: 0, kind: input, shape index: {}]   ;;  %s3133_s1 = inlined_call_operand.hbm [shape: f32[32,192], index: 1, kind: input, shape index: {}]   ;;  %s3134_s2 = inlined_call_operand.hbm [shape: f32[64,64], index: 2, kind: input, shape index: {}]   ;;  %s3135_s3 = inlined_call_operand.hbm [shape: f32[24,256], index: 3, kind: input, shape index: {}]   ;;  %s3136_s4 = inlined_call_operand.hbm [shape: f32[16,32], index: 4, kind: output, shape index: {}]  }
   0x1   :  { %10 = vsyncpa [#allocation6], 0 }
   0x2   :  { %11 = vsyncpa [#allocation9], 0 }
   0x3   :  { %12 = vsyncpa [#allocation4], 0  ;;  %s2609_s15 = smov [#allocation5]  }
   0x4   :  { %s30_s16 = sshll.u32 %s2609_s15, 4  ;;  %s31_s16 = int_to_ptr.vmem [resolvable:$true] %s30_s16 }
   0x5   :  { %s2509_s17 = scalar_lea.vmem %s31_s16, 1024  ;;  %p2514_p1 = scmp.lt.s32.totalorder %s31_s16, %s31_s16 }
   0x6   :  { %p2510_p0 = scmp.ne.s32.totalorder %s31_s16, %s2509_s17  ;;  %p2515_p2 = scmp.lt.s32.totalorder %s2509_s17, %s2509_s17 }
   0x8   :  { %p2516_p3 = por %p2515_p2, %p2514_p1 }
   0xa   :  { %p2517_p4 = pnand %p2516_p3, %p2510_p0 }
   0xc   :  { %2520 = shalt.err (!%p2517_p4)
}
   0xd   :  { %s2610_s18 = smov 256   ;;  %s2611_s19 = smov 16  }
   0xe   :  { %36 = dma.hbm_to_vmem [thread:$0]  %s3133_s1, 1024, %s31_s16, [#allocation6], %s2610_s18, %s2610_s18, %s2611_s19  }
   0xf   :  { %s2612_s22 = smov [#allocation2]  }
  0x10   :  { %s18_s23 = sshll.u32 %s2612_s22, 4  ;;  %s19_s23 = int_to_ptr.vmem [resolvable:$true] %s18_s23 }
  0x11   :  { %s2529_s24 = scalar_lea.vmem %s19_s23, 256  ;;  %p2534_p6 = scmp.lt.s32.totalorder %s19_s23, %s19_s23 }
  0x12   :  { %p2530_p5 = scmp.ne.s32.totalorder %s19_s23, %s2529_s24  ;;  %p2535_p7 = scmp.lt.s32.totalorder %s2529_s24, %s2529_s24 }
  0x14   :  { %p2536_p8 = por %p2535_p7, %p2534_p6 }
  0x16   :  { %p2537_p9 = pnand %p2536_p8, %p2530_p5 }
  0x18   :  { %2540 = shalt.err (!%p2537_p9)
}
  0x19   :  { %s2613_s25 = smov 128   ;;  %s2614_s26 = smov 8  }
  0x1a   :  { %24 = dma.hbm_to_vmem [thread:$0]  %s3132_s0, 256, %s19_s23, [#allocation3], %s2613_s25, %s2613_s25, %s2614_s26  }
  0x1b   :  { %s2615_s1 = smov [#allocation7]   ;;  %s2616_s30 = smov [#allocation8]  }
  0x1c   :  { %s42_s29 = sshll.u32 %s2615_s1, 4  ;;  %s54_s5 = sshll.u32 %s2616_s30, 4  ;;  %s43_s29 = int_to_ptr.vmem [resolvable:$true] %s42_s29  ;;  %s55_s5 = int_to_ptr.vmem [resolvable:$true] %s54_s5 }
  0x1d   :  { %s2549_s6 = scalar_lea.vmem %s43_s29, 1024  ;;  %p2554_p11 = scmp.lt.s32.totalorder %s43_s29, %s43_s29 }
  0x1e   :  { %p2550_p10 = scmp.ne.s32.totalorder %s43_s29, %s2549_s6  ;;  %p2555_p12 = scmp.lt.s32.totalorder %s2549_s6, %s2549_s6 }
  0x20   :  { %p2556_p13 = por %p2555_p12, %p2554_p11 }
  0x22   :  { %p2557_p0 = pnand %p2556_p13, %p2550_p10 }
  0x24   :  { %2560 = shalt.err (!%p2557_p0)
}
  0x25   :  { %48 = dma.hbm_to_vmem [thread:$0]  %s3134_s2, 1024, %s43_s29, [#allocation6], %s2613_s25, %s2613_s25, %s2614_s26  }
  0x26   :  { %s2569_s0 = scalar_lea.vmem %s55_s5, 768  ;;  %p2574_p2 = scmp.lt.s32.totalorder %s55_s5, %s55_s5 }
  0x27   :  { %p2570_p1 = scmp.ne.s32.totalorder %s55_s5, %s2569_s0  ;;  %p2575_p3 = scmp.lt.s32.totalorder %s2569_s0, %s2569_s0 }
  0x29   :  { %p2576_p4 = por %p2575_p3, %p2574_p2 }
  0x2b   :  { %p2577_p5 = pnand %p2576_p4, %p2570_p1 }
  0x2d   :  { %2580 = shalt.err (!%p2577_p5)
}
  0x2e   :  { %60 = dma.hbm_to_vmem [thread:$0]  %s3135_s3, 768, %s55_s5, [#allocation9], %s2610_s18, %s2610_s18, %s2611_s19  }
  0x2f   :  { %2601 = dma.done.wait [#allocation3], 256  }
  0x30   :  { %2602 = vsyncadd [#allocation3], 4294967040 }
  0x31   :  { %2603 = dma.done.wait [#allocation6], 2048  }
  0x32   :  { %2604 = vsyncadd [#allocation6], 4294965248 }
  0x33   :  { %2605 = dma.done.wait [#allocation9], 768  }
  0x34   :  { %2606 = vsyncadd [#allocation9], 4294966528  ;;  %v2617_v0 = vmov 0.0   ;;  %v88_v1 = vld [vmem:[#allocation5 + $0x38] sm:$0xff]  ;;  %v87_v2 = vld [vmem:[#allocation5 + $0x30] sm:$0xff]  ;;  %vm100_vm0 = vcmask 261120   ;;  %v90_v11 = vlaneseq }
  0x35   :  { %171 = vmatprep.mubr.f32.mxu1 %v2617_v0  ;;  %v86_v3 = vld [vmem:[#allocation5 + $0x28] sm:$0xff]  ;;  %131 = vmatprep.subr.mxu1 %v88_v1  ;;  %v85_v4 = vld [vmem:[#allocation5 + $0x20] sm:$0xff]  ;;  %v84_v5 = vld [vmem:[#allocation5 + $0x18] sm:$0xff]  ;;  %vm236_vm1 = vcmask 64512   ;;  %s2618_s2 = smov 112   ;;  %s2619_s3 = smov 120  }
  0x36   :  { %132 = vmatpush1.msra.mxu1 %v87_v2  ;;  %v83_v6 = vld [vmem:[#allocation5 + $0x10] sm:$0xff]  ;;  %v82_v7 = vld [vmem:[#allocation5 + $0x8] sm:$0xff]  ;;  %v81_v8 = vld [vmem:[#allocation5] sm:$0xff]  ;;  %v2677_v12 = vshrl.u32 %v90_v11, 7  ;;  %s2620_s11 = smov 104   ;;  %s2621_s12 = smov 24  }
  0x37   :  { %133 = vmatprep.subr.mxu1 %v86_v3  ;;  %v73_v9 = vld [vmem:[#allocation2] sm:$0xff]  ;;  %v74_v10 = vld [vmem:[#allocation2 + $0x8] sm:$0xff]  ;;  %v78_v14 = vld [vmem:[#allocation8 + $0x20] ss:$8 sm:$0x3]  ;;  %s2622_s13 = smov 32  }
  0x38   :  { %134 = vmatpush1.msra.mxu1 %v85_v4  ;;  %v92_v13 = vsub.s32 0, %v2677_v12  ;;  %v96_v21 = vsub.s32 1, %v2677_v12  ;;  %s2623_s14 = smov 96   ;;  %s2624_s15 = smov 64   ;;  %vm929_vm2 = vcmask 130048   ;;  %vm1878_vm3 = vcmask 195584  }
  0x39   :  { %135 = vmatprep.subr.mxu1 %v84_v5  ;;  %v76_v5 = vld [vmem:[#allocation8 + $0x10] sm:$0xff]  ;;  %vm1929_vm4 = vcmask 523264   ;;  %s2625_s16 = smov [#allocation10]  }
  0x3a   :  { %136 = vmatpush1.msra.mxu1 %v83_v6  ;;  %v93_v15 = vrot.slane %v78_v14, %v92_v13  ;;  %v97_v23 = vrot.slane %v78_v14, %v96_v21  ;;  %s2139_s17 = sshll.u32 %s2625_s16, 4  ;;  %s2140_s17 = int_to_ptr.vmem [resolvable:$true] %s2139_s17 }
  0x3b   :  { %137 = vmatprep.subr.mxu1 %v82_v7  ;;  %v75_v7 = vld [vmem:[#allocation8] sm:$0xff]  ;;  %s2581_s18 = scalar_lea.vmem %s2140_s17, 256  ;;  %p2586_p7 = scmp.lt.s32.totalorder %s2140_s17, %s2140_s17 }
  0x3c   :  { %138 = vmatpush1.msra.mxu1 %v81_v8  ;;  %p2582_p6 = scmp.ne.s32.totalorder %s2140_s17, %s2581_s18  ;;  %p2587_p8 = scmp.lt.s32.totalorder %s2581_s18, %s2581_s18 }
  0x3d   :  { %2153 = vmatmul.mubr.msk.f32.vlgmr.msra.gmra.mxu1 %vm100_vm0, %v73_v9 }
  0x3e   :  { %177 = vmatprep.mubr.f32.mxu1 %v2617_v0  ;;  %p2588_p9 = por %p2587_p8, %p2586_p7 }
  0x40   :  { %p2589_p10 = pnand %p2588_p9, %p2582_p6 }
  0x41   :  { %2154 = vmatmul.mubr.msk.f32.gmra.mxu1 %vm100_vm0, %v74_v10 }
  0xfd   :  { %v173_v16 = vpop.f32.mrf.mxu1 }
  0xfe   :  { %v2680_v17 = vadd.f32 %v173_v16, %v93_v15 }
  0xff   :  { %v175_v18 = vpop.f32.mrf.mxu1 }
 0x100   :  { %2283 = vmatprep.mubr.msk.f32.mxu1 %vm236_vm1, %v2680_v17  ;;  %v176_v25 = vadd.f32 %v175_v18, %v97_v23 }
 0x101   :  { %v179_v19 = vpop.f32.mrf.mxu1 }
 0x102   :  { %v2684_v20 = vadd.f32 %v179_v19, %v93_v15 }
 0x103   :  { %v181_v22 = vpop.f32.mrf.mxu1 }
 0x104   :  { %192 = vrot.lane.b32.xlu1 %v2684_v20, %s2618_s2  ;;  %188 = vrot.lane.b32.xlu0 %v2684_v20, %s2619_s3  ;;  %v182_v24 = vadd.f32 %v181_v22, %v97_v23 }
 0x108   :  { %196 = vrot.lane.b32.xlu1 %v2684_v20, %s2620_s11  ;;  %186 = vrot.lane.b32.xlu0 %v2680_v17, %s2619_s3 }
 0x10c   :  { %194 = vrot.lane.b32.xlu1 %v2680_v17, %s2620_s11  ;;  %190 = vrot.lane.b32.xlu0 %v2680_v17, %s2618_s2 }
 0x110   :  { %222 = vrot.lane.b32.xlu1 %v182_v24, %s2621_s12  ;;  %218 = vrot.lane.b32.xlu0 %v182_v24, %s2622_s13 }
 0x114   :  { %220 = vrot.lane.b32.xlu1 %v176_v25, %s2621_s12  ;;  %216 = vrot.lane.b32.xlu0 %v176_v25, %s2622_s13 }
 0x118   :  { %230 = vrot.lane.b32.xlu1 %v182_v24, %s2614_s26  ;;  %226 = vrot.lane.b32.xlu0 %v182_v24, %s2611_s19 }
 0x11c   :  { %228 = vrot.lane.b32.xlu1 %v176_v25, %s2614_s26  ;;  %224 = vrot.lane.b32.xlu0 %v176_v25, %s2611_s19 }
 0x120   :  { %234 = vrot.lane.b32.xlu0 %v2684_v20, %s2623_s14 }
 0x124   :  { %232 = vrot.lane.b32.xlu0 %v2680_v17, %s2623_s14 }
 0x128   :  { %198 = vrot.lane.b32.xlu0 %v2680_v17, %s2622_s13 }
 0x176   :  { %v2707_v26 = vpop.permute.xlu1 %192  ;;  %v2709_v27 = vpop.permute.xlu0 %188 }
 0x17a   :  { %v2711_v28 = vpop.permute.xlu1 %196  ;;  %v187_v29 = vpop.permute.xlu0 %186 }
 0x17b   :  { %2290 = vmatprep.mubr.msk.f32.mxu0 %vm236_vm1, %v187_v29  ;;  %320 = vrot.lane.b32.xlu1 %v187_v29, %s2623_s14 }
 0x17e   :  { %v2715_v30 = vpop.permute.xlu1 %194  ;;  %v191_v31 = vpop.permute.xlu0 %190 }
 0x17f   :  { %494 = vrot.lane.b32.xlu1 %v2715_v30, %s2623_s14  ;;  %407 = vrot.lane.b32.xlu0 %v191_v31, %s2623_s14 }
 0x182   :  { %v2720_v32 = vpop.permute.xlu1 %222  ;;  %v2722_v33 = vpop.permute.xlu0 %218 }
 0x186   :  { %v2724_v34 = vpop.permute.xlu1 %220  ;;  %v2726_v35 = vpop.permute.xlu0 %216 }
 0x187   :  { %668 = vrot.lane.b32.xlu1 %v2724_v34, %s2623_s14  ;;  %581 = vrot.lane.b32.xlu0 %v2726_v35, %s2623_s14 }
 0x18a   :  { %v2732_v36 = vpop.permute.xlu0 %226  ;;  %v2756_v40 = vpop.permute.xlu1 %230 }
 0x18b   :  { %322 = vrot.lane.b32.xlu1 %v2709_v27, %s2623_s14  ;;  %409 = vrot.lane.b32.xlu0 %v2707_v26, %s2623_s14 }
 0x18e   :  { %v2738_v37 = vpop.permute.xlu0 %224  ;;  %v2769_v41 = vpop.permute.xlu1 %228 }
 0x18f   :  { %202 = vrot.lane.b32.xlu1 %v2680_v17, %s2621_s12  ;;  %200 = vrot.lane.b32.xlu0 %v2684_v20, %s2622_s13 }
 0x192   :  { %v235_v38 = vpop.permute.xlu0 %234 }
 0x193   :  { %496 = vrot.lane.b32.xlu1 %v2711_v28, %s2623_s14  ;;  %583 = vrot.lane.b32.xlu0 %v2722_v33, %s2623_s14 }
 0x194   :  { %2279 = vmatprep.subr.msk.mxu1 %vm236_vm1, %v235_v38 }
 0x195   :  { %2280 = vmatpush3.xpose.msk.msra.mxu1 %vm236_vm1, %v235_v38 }
 0x196   :  { %v233_v39 = vpop.permute.xlu0 %232 }
 0x197   :  { %204 = vrot.lane.b32.xlu1 %v2684_v20, %s2621_s12  ;;  %755 = vrot.lane.b32.xlu0 %v2738_v37, %s2623_s14 }
 0x198   :  { %2281 = vmatprep.subr.msk.mxu1 %vm236_vm1, %v233_v39 }
 0x199   :  { %2282 = vmatpush3.xpose.msk.msra.mxu1 %vm236_vm1, %v233_v39 }
 0x19a   :  { %v199_v43 = vpop.permute.xlu0 %198 }
 0x19b   :  { %670 = vrot.lane.b32.xlu1 %v2720_v32, %s2623_s14  ;;  %844 = vrot.lane.b32.xlu0 %v2756_v40, %s2623_s14 }
 0x19c   :  { %2284 = vmatmul.mubr.msk.f32.vlgmr.msra.gmra.mxu1 %vm236_vm1, %v2684_v20 }
 0x19d   :  { %2297 = vmatprep.mubr.msk.f32.mxu1 %vm236_vm1, %v191_v31 }
 0x19f   :  { %757 = vrot.lane.b32.xlu1 %v2732_v36, %s2623_s14  ;;  %206 = vrot.lane.b32.xlu0 %v2680_v17, %s2611_s19 }
 0x1a3   :  { %842 = vrot.lane.b32.xlu1 %v2769_v41, %s2623_s14  ;;  %210 = vrot.lane.b32.xlu0 %v2680_v17, %s2614_s26 }
 0x1a7   :  { %208 = vrot.lane.b32.xlu1 %v2684_v20, %s2611_s19  ;;  %1154 = vrot.lane.b32.xlu0 %v2680_v17, %s2624_s15 }
 0x1ab   :  { %212 = vrot.lane.b32.xlu1 %v2684_v20, %s2614_s26  ;;  %1330 = vrot.lane.b32.xlu0 %v2707_v26, %s2624_s15 }
 0x1af   :  { %1156 = vrot.lane.b32.xlu1 %v2684_v20, %s2624_s15  ;;  %1328 = vrot.lane.b32.xlu0 %v191_v31, %s2624_s15 }
 0x1b3   :  { %1243 = vrot.lane.b32.xlu1 %v2709_v27, %s2624_s15 }
 0x1b7   :  { %1241 = vrot.lane.b32.xlu1 %v187_v29, %s2624_s15 }
 0x1bb   :  { %1417 = vrot.lane.b32.xlu1 %v2711_v28, %s2624_s15 }
 0x1bf   :  { %1415 = vrot.lane.b32.xlu1 %v2715_v30, %s2624_s15 }
 0x1ed   :  { %v321_v42 = vpop.permute.xlu1 %320 }
 0x1f1   :  { %v495_v44 = vpop.permute.xlu1 %494  ;;  %v408_v45 = vpop.permute.xlu0 %407 }
 0x1f9   :  { %v669_v46 = vpop.permute.xlu1 %668  ;;  %v582_v47 = vpop.permute.xlu0 %581 }
 0x1fd   :  { %v323_v48 = vpop.permute.xlu1 %322  ;;  %v410_v49 = vpop.permute.xlu0 %409 }
 0x1fe   :  { %2286 = vmatprep.subr.msk.mxu0 %vm236_vm1, %v323_v48  ;;  %2293 = vmatprep.subr.msk.mxu1 %vm236_vm1, %v410_v49 }
 0x1ff   :  { %2287 = vmatpush3.xpose.msk.msra.mxu0 %vm236_vm1, %v323_v48  ;;  %2294 = vmatpush3.xpose.msk.msra.mxu1 %vm236_vm1, %v410_v49 }
 0x200   :  { %2288 = vmatprep.subr.msk.mxu0 %vm236_vm1, %v321_v42  ;;  %2295 = vmatprep.subr.msk.mxu1 %vm236_vm1, %v408_v45 }
 0x201   :  { %v203_v50 = vpop.permute.xlu1 %202  ;;  %v201_v51 = vpop.permute.xlu0 %200 }
 0x203   :  { %2289 = vmatpush3.xpose.msk.msra.mxu0 %vm236_vm1, %v321_v42  ;;  %2296 = vmatpush3.xpose.msk.msra.mxu1 %vm236_vm1, %v408_v45 }
 0x205   :  { %v497_v52 = vpop.permute.xlu1 %496  ;;  %v584_v53 = vpop.permute.xlu0 %583 }
 0x206   :  { %2291 = vmatmul.mubr.msk.f32.vlgmr.msra.gmra.mxu0 %vm236_vm1, %v2709_v27  ;;  %2298 = vmatmul.mubr.msk.f32.vlgmr.msra.gmra.mxu1 %vm236_vm1, %v2707_v26 }
 0x207   :  { %2300 = vmatprep.subr.msk.mxu0 %vm236_vm1, %v497_v52  ;;  %2307 = vmatprep.subr.msk.mxu1 %vm236_vm1, %v584_v53 }
 0x208   :  { %2301 = vmatpush3.xpose.msk.msra.mxu0 %vm236_vm1, %v497_v52  ;;  %2304 = vmatprep.mubr.msk.f32.mxu0 %vm236_vm1, %v2715_v30 }
 0x209   :  { %2308 = vmatpush3.xpose.msk.msra.mxu1 %vm236_vm1, %v584_v53  ;;  %2311 = vmatprep.mubr.msk.f32.mxu1 %vm236_vm1, %v199_v43  ;;  %v205_v54 = vpop.permute.xlu1 %204  ;;  %v756_v55 = vpop.permute.xlu0 %755 }
 0x20a   :  { %2302 = vmatprep.subr.msk.mxu0 %vm236_vm1, %v495_v44  ;;  %2309 = vmatprep.subr.msk.mxu1 %vm236_vm1, %v582_v47 }
 0x20c   :  { %2303 = vmatpush3.xpose.msk.msra.mxu0 %vm236_vm1, %v495_v44 }
 0x20d   :  { %2310 = vmatpush3.xpose.msk.msra.mxu1 %vm236_vm1, %v582_v47  ;;  %v671_v56 = vpop.permute.xlu1 %670  ;;  %v845_v57 = vpop.permute.xlu0 %844 }
 0x20e   :  { %2314 = vmatprep.subr.msk.mxu0 %vm236_vm1, %v671_v56 }
 0x20f   :  { %2305 = vmatmul.mubr.msk.f32.vlgmr.msra.gmra.mxu0 %vm236_vm1, %v2711_v28 }
 0x210   :  { %2312 = vmatmul.mubr.msk.f32.vlgmr.msra.gmra.mxu1 %vm236_vm1, %v201_v51  ;;  %2315 = vmatpush3.xpose.msk.msra.mxu0 %vm236_vm1, %v671_v56 }
 0x211   :  { %2318 = vmatprep.mubr.msk.f32.mxu0 %vm236_vm1, %v203_v50  ;;  %2316 = vmatprep.subr.msk.mxu0 %vm236_vm1, %v669_v46  ;;  %v758_v58 = vpop.permute.xlu1 %757  ;;  %v207_v59 = vpop.permute.xlu0 %206 }
 0x212   :  { %2321 = vmatprep.subr.msk.mxu1 %vm236_vm1, %v758_v58  ;;  %2325 = vmatprep.mubr.msk.f32.mxu1 %vm236_vm1, %v207_v59 }
 0x213   :  { %2322 = vmatpush3.xpose.msk.msra.mxu1 %vm236_vm1, %v758_v58 }
 0x214   :  { %2317 = vmatpush3.xpose.msk.msra.mxu0 %vm236_vm1, %v669_v46  ;;  %2323 = vmatprep.subr.msk.mxu1 %vm236_vm1, %v756_v55 }
 0x215   :  { %2328 = vmatprep.subr.msk.mxu0 %vm236_vm1, %v845_v57  ;;  %v843_v60 = vpop.permute.xlu1 %842  ;;  %v211_v61 = vpop.permute.xlu0 %210 }
 0x217   :  { %2319 = vmatmul.mubr.msk.f32.vlgmr.msra.gmra.mxu0 %vm236_vm1, %v205_v54  ;;  %2324 = vmatpush3.xpose.msk.msra.mxu1 %vm236_vm1, %v756_v55 }
 0x218   :  { %2329 = vmatpush3.xpose.msk.msra.mxu0 %vm236_vm1, %v845_v57  ;;  %2332 = vmatprep.mubr.msk.f32.mxu0 %vm236_vm1, %v211_v61 }
 0x219   :  { %2330 = vmatprep.subr.msk.mxu0 %vm236_vm1, %v843_v60  ;;  %v209_v62 = vpop.permute.xlu1 %208  ;;  %v1155_v63 = vpop.permute.xlu0 %1154 }
 0x21a   :  { %2326 = vmatmul.mubr.msk.f32.vlgmr.msra.gmra.mxu1 %vm236_vm1, %v209_v62 }
 0x21c   :  { %2331 = vmatpush3.xpose.msk.msra.mxu0 %vm236_vm1, %v843_v60 }
 0x21d   :  { %v213_v0 = vpop.permute.xlu1 %212  ;;  %v1331_v1 = vpop.permute.xlu0 %1330 }
 0x21e   :  { %2349 = vmatprep.subr.mxu0 %v1331_v1 }
 0x21f   :  { %2333 = vmatmul.mubr.msk.f32.vlgmr.msra.gmra.mxu0 %vm236_vm1, %v213_v0 }
 0x220   :  { %2350 = vmatpush3.msra.mxu0 %v1331_v1 }
 0x221   :  { %v1157_v2 = vpop.permute.xlu1 %1156  ;;  %v1329_v3 = vpop.permute.xlu0 %1328 }
 0x222   :  { %2335 = vmatprep.subr.mxu1 %v1157_v2  ;;  %2351 = vmatprep.subr.mxu0 %v1329_v3 }
 0x223   :  { %2336 = vmatpush3.msra.mxu1 %v1157_v2  ;;  %2352 = vmatpush3.msra.mxu0 %v1329_v3 }
 0x224   :  { %2337 = vmatprep.subr.mxu1 %v1155_v63 }
 0x225   :  { %v2837_v4 = vpop.permute.xlu1 %1243  ;;  %2338 = vmatpush3.msra.mxu1 %v1155_v63 }
 0x226   :  { %2342 = vmatprep.subr.mxu1 %v2837_v4 }
 0x229   :  { %v2906_v0 = vpop.permute.xlu1 %1241 }
 0x22d   :  { %v2912_v1 = vpop.permute.xlu1 %1417 }
 0x231   :  { %v2918_v2 = vpop.permute.xlu1 %1415 }
 0x25c   :  { %v2285_v6 = vpop.f32.mrf.mxu1 }
 0x25d   :  { %v2840_v8 = vadd.f32 %v2285_v6, %v76_v5 }
 0x25e   :  { %v311_v9 = vpop.f32.mrf.mxu1 }
 0x25f   :  { %v2842_v10 = vadd.f32 %v311_v9, %v75_v7  ;;  %v933_v11 = vsel %vm929_vm2, %v2840_v8, -inf }
 0x260   :  { %934 = vmax.xlane.f32.xlu1 %v933_v11 }
 0x261   :  { %v930_v13 = vsel %vm929_vm2, %v2842_v10, -inf }
 0x262   :  { %931 = vmax.xlane.f32.xlu0 %v930_v13 }
 0x2c6   :  { %v2292_v14 = vpop.f32.mrf.mxu0  ;;  %v2299_v15 = vpop.f32.mrf.mxu1 }
 0x2c7   :  { %v2848_v16 = vadd.f32 %v2292_v14, %v76_v5  ;;  %v2850_v18 = vadd.f32 %v2299_v15, %v76_v5 }
 0x2c8   :  { %v485_v17 = vpop.f32.mrf.mxu1  ;;  %v398_v21 = vpop.f32.mrf.mxu0 }
 0x2c9   :  { %v2852_v19 = vadd.f32 %v485_v17, %v75_v7  ;;  %v939_v20 = vsel %vm929_vm2, %v2848_v16, -inf  ;;  %v2858_v23 = vadd.f32 %v398_v21, %v75_v7  ;;  %v945_v24 = vsel %vm929_vm2, %v2850_v18, -inf }
 0x2ca   :  { %940 = vmax.xlane.f32.xlu0 %v939_v20 }
 0x2cb   :  { %v942_v22 = vsel %vm929_vm2, %v2852_v19, -inf  ;;  %v936_v29 = vsel %vm929_vm2, %v2858_v23, -inf }
 0x2cc   :  { %943 = vmax.xlane.f32.xlu1 %v942_v22 }
 0x2ce   :  { %946 = vmax.xlane.f32.xlu0 %v945_v24 }
 0x2cf   :  { %v2306_v25 = vpop.f32.mrf.mxu0 }
 0x2d0   :  { %v2313_v26 = vpop.f32.mrf.mxu1  ;;  %v2862_v27 = vadd.f32 %v2306_v25, %v76_v5 }
 0x2d1   :  { %v572_v28 = vpop.f32.mrf.mxu0  ;;  %v2872_v42 = vadd.f32 %v2313_v26, %v76_v5 }
 0x2d2   :  { %v2866_v30 = vadd.f32 %v572_v28, %v75_v7  ;;  %v659_v31 = vpop.f32.mrf.mxu1  ;;  %937 = vmax.xlane.f32.xlu0 %v936_v29  ;;  %v951_v43 = vsel %vm929_vm2, %v2862_v27, -inf }
 0x2d3   :  { %v2868_v38 = vadd.f32 %v659_v31, %v75_v7  ;;  %v957_v48 = vsel %vm929_vm2, %v2872_v42, -inf }
 0x2d4   :  { %v948_v39 = vsel %vm929_vm2, %v2866_v30, -inf }
 0x2d5   :  { %949 = vmax.xlane.f32.xlu1 %v948_v39  ;;  %v954_v45 = vsel %vm929_vm2, %v2868_v38, -inf }
 0x2d6   :  { %952 = vmax.xlane.f32.xlu0 %v951_v43 }
 0x2d7   :  { %v2320_v44 = vpop.f32.mrf.mxu0 }
 0x2d8   :  { %v2878_v46 = vadd.f32 %v2320_v44, %v76_v5 }
 0x2d9   :  { %v746_v47 = vpop.f32.mrf.mxu0  ;;  %955 = vmax.xlane.f32.xlu1 %v954_v45 }
 0x2da   :  { %v2882_v49 = vadd.f32 %v746_v47, %v75_v7  ;;  %v2327_v50 = vpop.f32.mrf.mxu1  ;;  %958 = vmax.xlane.f32.xlu0 %v957_v48  ;;  %v963_v55 = vsel %vm929_vm2, %v2878_v46, -inf }
 0x2db   :  { %v2886_v53 = vadd.f32 %v2327_v50, %v76_v5 }
 0x2dc   :  { %v833_v51 = vpop.f32.mrf.mxu1  ;;  %v960_v52 = vsel %vm929_vm2, %v2882_v49, -inf }
 0x2dd   :  { %v2888_v54 = vadd.f32 %v833_v51, %v75_v7  ;;  %961 = vmax.xlane.f32.xlu1 %v960_v52  ;;  %v969_v60 = vsel %vm929_vm2, %v2886_v53, -inf }
 0x2de   :  { %964 = vmax.xlane.f32.xlu0 %v963_v55 }
 0x2df   :  { %v2334_v56 = vpop.f32.mrf.mxu0  ;;  %v966_v57 = vsel %vm929_vm2, %v2888_v54, -inf }
 0x2e0   :  { %v2894_v58 = vadd.f32 %v2334_v56, %v76_v5 }
 0x2e1   :  { %v920_v59 = vpop.f32.mrf.mxu0  ;;  %967 = vmax.xlane.f32.xlu1 %v966_v57 }
 0x2e2   :  { %v2898_v61 = vadd.f32 %v920_v59, %v75_v7  ;;  %970 = vmax.xlane.f32.xlu0 %v969_v60  ;;  %v975_v63 = vsel %vm929_vm2, %v2894_v58, -inf }
 0x2e4   :  { %v972_v62 = vsel %vm929_vm2, %v2898_v61, -inf }
 0x2e5   :  { %973 = vmax.xlane.f32.xlu1 %v972_v62 }
 0x2e6   :  { %976 = vmax.xlane.f32.xlu0 %v975_v63 }
 0x2e9   :  { %v935_v3 = vpop.xlane.xlu1 %934 }
 0x2ea   :  { %v979_v5 = vsub.f32 %v2840_v8, %v935_v3 }
 0x2ec   :  { %v996_v6 = vmul.f32 1.442695, %v979_v5 }
 0x2f6   :  { %1591 = vrot.lane.b32.xlu1 %v2720_v32, %s2624_s15  ;;  %v932_v32 = vpop.xlane.xlu0 %931 }
 0x2fa   :  { %1589 = vrot.lane.b32.xlu1 %v2724_v34, %s2624_s15  ;;  %v978_v34 = vsub.f32 %v2842_v10, %v932_v32 }
 0x2fc   :  { %1504 = vrot.lane.b32.xlu0 %v2722_v33, %s2624_s15  ;;  %v994_v33 = vmul.f32 1.442695, %v978_v34 }
 0x2fe   :  { %1765 = vrot.lane.b32.xlu1 %v2756_v40, %s2624_s15  ;;  %2427 = vpow2.f32 %v994_v33 }
 0x2ff   :  { %2429 = vpow2.f32 %v996_v6 }
 0x300   :  { %1502 = vrot.lane.b32.xlu0 %v2726_v35, %s2624_s15 }
 0x304   :  { %1678 = vrot.lane.b32.xlu0 %v2732_v36, %s2624_s15 }
 0x30b   :  { %v2924_v7 = vpop.eup %2427 }
 0x30c   :  { %v2926_v40 = vpop.eup %2429  ;;  %v1026_v35 = vsel %vm929_vm2, %v2924_v7, 0.0 }
 0x30d   :  { %v1029_v36 = vsel %vm929_vm2, %v2926_v40, 0.0 }
 0x322   :  { %1027 = vadd.xlane.f32.xlu1 %v1026_v35 }
 0x323   :  { %1030 = vadd.xlane.f32.xlu0 %v1029_v36 }
 0x353   :  { %v941_v9 = vpop.xlane.xlu0 %940 }
 0x354   :  { %v981_v10 = vsub.f32 %v2848_v16, %v941_v9 }
 0x355   :  { %v944_v11 = vpop.xlane.xlu1 %943 }
 0x356   :  { %v1000_v8 = vmul.f32 1.442695, %v981_v10  ;;  %v982_v15 = vsub.f32 %v2852_v19, %v944_v11 }
 0x357   :  { %v947_v13 = vpop.xlane.xlu0 %946 }
 0x358   :  { %2431 = vpow2.f32 %v1000_v8  ;;  %v983_v14 = vsub.f32 %v2850_v18, %v947_v13  ;;  %v1002_v22 = vmul.f32 1.442695, %v982_v15 }
 0x35a   :  { %v1004_v17 = vmul.f32 1.442695, %v983_v14 }
 0x35b   :  { %v938_v20 = vpop.xlane.xlu0 %937 }
 0x35c   :  { %2433 = vpow2.f32 %v1004_v17  ;;  %v980_v21 = vsub.f32 %v2858_v23, %v938_v20 }
 0x35e   :  { %v998_v24 = vmul.f32 1.442695, %v980_v21  ;;  %v950_v25 = vpop.xlane.xlu1 %949 }
 0x35f   :  { %v984_v26 = vsub.f32 %v2866_v30, %v950_v25  ;;  %v953_v28 = vpop.xlane.xlu0 %952 }
 0x360   :  { %2435 = vpow2.f32 %v998_v24  ;;  %v985_v16 = vsub.f32 %v2862_v27, %v953_v28 }
 0x361   :  { %2437 = vpow2.f32 %v1002_v22  ;;  %v1006_v29 = vmul.f32 1.442695, %v984_v26 }
 0x362   :  { %v1008_v31 = vmul.f32 1.442695, %v985_v16  ;;  %v956_v18 = vpop.xlane.xlu1 %955 }
 0x363   :  { %v986_v19 = vsub.f32 %v2868_v38, %v956_v18  ;;  %v959_v39 = vpop.xlane.xlu0 %958 }
 0x364   :  { %2439 = vpow2.f32 %v1008_v31  ;;  %v987_v43 = vsub.f32 %v2872_v42, %v959_v39 }
 0x365   :  { %v2940_v23 = vpop.eup %2431  ;;  %2441 = vpow2.f32 %v1006_v29  ;;  %v1010_v44 = vmul.f32 1.442695, %v986_v19 }
 0x366   :  { %v1012_v45 = vmul.f32 1.442695, %v987_v43  ;;  %v962_v30 = vpop.xlane.xlu1 %961  ;;  %v1035_v47 = vsel %vm929_vm2, %v2940_v23, 0.0 }
 0x367   :  { %v988_v27 = vsub.f32 %v2882_v49, %v962_v30  ;;  %1036 = vadd.xlane.f32.xlu0 %v1035_v47  ;;  %v965_v48 = vpop.xlane.xlu0 %964 }
 0x368   :  { %2443 = vpow2.f32 %v1012_v45  ;;  %v989_v38 = vsub.f32 %v2878_v46, %v965_v48 }
 0x369   :  { %v2946_v50 = vpop.eup %2433  ;;  %2445 = vpow2.f32 %v1010_v44  ;;  %v1014_v42 = vmul.f32 1.442695, %v988_v27 }
 0x36a   :  { %v1016_v51 = vmul.f32 1.442695, %v989_v38  ;;  %v968_v52 = vpop.xlane.xlu1 %967  ;;  %v1041_v55 = vsel %vm929_vm2, %v2946_v50, 0.0 }
 0x36b   :  { %v990_v56 = vsub.f32 %v2888_v54, %v968_v52  ;;  %1042 = vadd.xlane.f32.xlu0 %v1041_v55  ;;  %v971_v57 = vpop.xlane.xlu0 %970 }
 0x36c   :  { %2447 = vpow2.f32 %v1016_v51  ;;  %v991_v49 = vsub.f32 %v2886_v53, %v971_v57 }
 0x36d   :  { %v2952_v59 = vpop.eup %2435  ;;  %2449 = vpow2.f32 %v1014_v42  ;;  %v1018_v46 = vmul.f32 1.442695, %v990_v56 }
 0x36e   :  { %v2954_v60 = vpop.eup %2437  ;;  %v1020_v62 = vmul.f32 1.442695, %v991_v49  ;;  %v974_v63 = vpop.xlane.xlu1 %973  ;;  %v1032_v32 = vsel %vm929_vm2, %v2952_v59, 0.0 }
 0x36f   :  { %v992_v3 = vsub.f32 %v2898_v61, %v974_v63  ;;  %1033 = vadd.xlane.f32.xlu1 %v1032_v32  ;;  %v977_v54 = vpop.xlane.xlu0 %976  ;;  %v1038_v53 = vsel %vm929_vm2, %v2954_v60, 0.0 }
 0x370   :  { %2451 = vpow2.f32 %v1020_v62  ;;  %v993_v34 = vsub.f32 %v2894_v58, %v977_v54 }
 0x371   :  { %v2960_v5 = vpop.eup %2439  ;;  %2453 = vpow2.f32 %v1018_v46  ;;  %v1022_v33 = vmul.f32 1.442695, %v992_v3 }
 0x372   :  { %v1024_v6 = vmul.f32 1.442695, %v993_v34  ;;  %v1047_v35 = vsel %vm929_vm2, %v2960_v5, 0.0  ;;  %v2966_v36 = vpop.eup %2441  ;;  %v3009_v29 = vpop.permute.xlu1 %1591 }
 0x373   :  { %1039 = vadd.xlane.f32.xlu1 %v1038_v53  ;;  %1048 = vadd.xlane.f32.xlu0 %v1047_v35  ;;  %v2968_v61 = vpop.permute.xlu0 %1504  ;;  %v1044_v9 = vsel %vm929_vm2, %v2966_v36, 0.0 }
 0x374   :  { %2455 = vpow2.f32 %v1024_v6  ;;  %2363 = vmatprep.subr.mxu0 %v2968_v61 }
 0x375   :  { %v2971_v58 = vpop.eup %2443  ;;  %2457 = vpow2.f32 %v1022_v33 }
 0x376   :  { %v1053_v10 = vsel %vm929_vm2, %v2971_v58, 0.0  ;;  %v2977_v8 = vpop.eup %2445  ;;  %v3011_v31 = vpop.permute.xlu1 %1589 }
 0x377   :  { %1045 = vadd.xlane.f32.xlu1 %v1044_v9  ;;  %1054 = vadd.xlane.f32.xlu0 %v1053_v10  ;;  %v1050_v13 = vsel %vm929_vm2, %v2977_v8, 0.0  ;;  %v3013_v18 = vpop.permute.xlu0 %1502 }
 0x379   :  { %v2979_v11 = vpop.eup %2447 }
 0x37a   :  { %v1059_v14 = vsel %vm929_vm2, %v2979_v11, 0.0  ;;  %v2985_v15 = vpop.eup %2449  ;;  %v3015_v19 = vpop.permute.xlu1 %1765 }
 0x37b   :  { %1051 = vadd.xlane.f32.xlu1 %v1050_v13  ;;  %1060 = vadd.xlane.f32.xlu0 %v1059_v14  ;;  %v1056_v20 = vsel %vm929_vm2, %v2985_v15, 0.0  ;;  %v3017_v39 = vpop.permute.xlu0 %1678 }
 0x37d   :  { %v2987_v17 = vpop.eup %2451 }
 0x37e   :  { %v1065_v21 = vsel %vm929_vm2, %v2987_v17, 0.0  ;;  %v2993_v22 = vpop.eup %2453 }
 0x37f   :  { %1057 = vadd.xlane.f32.xlu1 %v1056_v20  ;;  %1066 = vadd.xlane.f32.xlu0 %v1065_v21  ;;  %v1062_v25 = vsel %vm929_vm2, %v2993_v22, 0.0 }
 0x381   :  { %v2995_v24 = vpop.eup %2455 }
 0x382   :  { %v1071_v26 = vsel %vm929_vm2, %v2995_v24, 0.0  ;;  %v3001_v28 = vpop.eup %2457 }
 0x383   :  { %1063 = vadd.xlane.f32.xlu1 %v1062_v25  ;;  %1072 = vadd.xlane.f32.xlu0 %v1071_v26  ;;  %v1068_v16 = vsel %vm929_vm2, %v3001_v28, 0.0 }
 0x387   :  { %1069 = vadd.xlane.f32.xlu1 %v1068_v16 }
 0x398   :  { %1763 = vrot.lane.b32.xlu1 %v2769_v41, %s2624_s15 }
 0x399   :  { %1676 = vrot.lane.b32.xlu0 %v2738_v37, %s2624_s15 }
 0x3ab   :  { %v1028_v43 = vpop.xlane.xlu1 %1027 }
 0x3ac   :  { %2459 = vrcp.f32 %v1028_v43  ;;  %v1031_v44 = vpop.xlane.xlu0 %1030 }
 0x3ad   :  { %2461 = vrcp.f32 %v1031_v44 }
 0x3b9   :  { %v2460_v45 = vpop.eup %2459 }
 0x3ba   :  { %v2462_v30 = vpop.eup %2461  ;;  %v1090_v41 = vmul.f32 %v2460_v45, %v1028_v43 }
 0x3bb   :  { %v1091_v47 = vmul.f32 %v2462_v30, %v1031_v44 }
 0x3bc   :  { %v1106_v27 = vsub.f32 2.0, %v1090_v41 }
 0x3bd   :  { %v1107_v37 = vsub.f32 2.0, %v1091_v47 }
 0x3be   :  { %v1122_v48 = vmul.f32 %v2460_v45, %v1106_v27 }
 0x3bf   :  { %v1123_v38 = vmul.f32 %v2462_v30, %v1107_v37 }
 0x3c0   :  { %v1138_v42 = vmul.f32 %v2924_v7, %v1122_v48 }
 0x3c1   :  { %v1139_v51 = vmul.f32 %v2926_v40, %v1123_v38 }
 0x3c2   :  { %2339 = vmatprep.mubr.msk.f32.mxu1 %vm929_vm2, %v1138_v42 }
 0x3c3   :  { %2340 = vmatmul.mubr.msk.f32.vlgmr.msra.gmra.mxu1 %vm929_vm2, %v1139_v51 }
 0x3c4   :  { %2343 = vmatpush3.msra.mxu1 %v2837_v4 }
 0x3c5   :  { %2344 = vmatprep.subr.mxu1 %v2906_v0 }
 0x3c6   :  { %2345 = vmatpush3.msra.mxu1 %v2906_v0 }
 0x3c7   :  { %2356 = vmatprep.subr.mxu1 %v2912_v1 }
 0x3f0   :  { %v1037_v52 = vpop.xlane.xlu0 %1036 }
 0x3f1   :  { %2463 = vrcp.f32 %v1037_v52 }
 0x3f4   :  { %v1043_v55 = vpop.xlane.xlu0 %1042 }
 0x3f5   :  { %2465 = vrcp.f32 %v1043_v55 }
 0x3f8   :  { %v1034_v56 = vpop.xlane.xlu1 %1033 }
 0x3f9   :  { %2467 = vrcp.f32 %v1034_v56 }
 0x3fc   :  { %v1040_v7 = vpop.xlane.xlu1 %1039  ;;  %v1049_v40 = vpop.xlane.xlu0 %1048 }
 0x3fd   :  { %2469 = vrcp.f32 %v1040_v7 }
 0x3fe   :  { %2471 = vrcp.f32 %v1049_v40  ;;  %v2464_v57 = vpop.eup %2463 }
 0x3ff   :  { %v1093_v4 = vmul.f32 %v2464_v57, %v1037_v52 }
 0x400   :  { %v1046_v49 = vpop.xlane.xlu1 %1045  ;;  %v1055_v46 = vpop.xlane.xlu0 %1054 }
 0x401   :  { %2473 = vrcp.f32 %v1046_v49  ;;  %v1109_v3 = vsub.f32 2.0, %v1093_v4 }
 0x402   :  { %2475 = vrcp.f32 %v1055_v46  ;;  %v2466_v62 = vpop.eup %2465 }
 0x403   :  { %v1095_v54 = vmul.f32 %v2466_v62, %v1043_v55  ;;  %v1125_v9 = vmul.f32 %v2464_v57, %v1109_v3 }
 0x404   :  { %v1052_v0 = vpop.xlane.xlu1 %1051  ;;  %v1061_v63 = vpop.xlane.xlu0 %1060 }
 0x405   :  { %2477 = vrcp.f32 %v1052_v0  ;;  %v1111_v10 = vsub.f32 2.0, %v1095_v54  ;;  %v1141_v45 = vmul.f32 %v2940_v23, %v1125_v9 }
 0x406   :  { %v2468_v32 = vpop.eup %2467  ;;  %2479 = vrcp.f32 %v1061_v63 }
 0x407   :  { %v1092_v34 = vmul.f32 %v2468_v32, %v1034_v56  ;;  %v1127_v30 = vmul.f32 %v2466_v62, %v1111_v10 }
 0x408   :  { %v1058_v53 = vpop.xlane.xlu1 %1057  ;;  %v1067_v33 = vpop.xlane.xlu0 %1066 }
 0x409   :  { %v1108_v6 = vsub.f32 2.0, %v1092_v34  ;;  %2481 = vrcp.f32 %v1058_v53  ;;  %v1143_v23 = vmul.f32 %v2946_v50, %v1127_v30 }
 0x40a   :  { %v2470_v35 = vpop.eup %2469  ;;  %2483 = vrcp.f32 %v1067_v33 }
 0x40b   :  { %v2472_v13 = vpop.eup %2471  ;;  %v1124_v14 = vmul.f32 %v2468_v32, %v1108_v6  ;;  %v1094_v20 = vmul.f32 %v2470_v35, %v1040_v7 }
 0x40c   :  { %v1097_v21 = vmul.f32 %v2472_v13, %v1049_v40  ;;  %v1064_v25 = vpop.xlane.xlu1 %1063  ;;  %v1073_v26 = vpop.xlane.xlu0 %1072 }
 0x40d   :  { %v1140_v16 = vmul.f32 %v2952_v59, %v1124_v14  ;;  %v1110_v43 = vsub.f32 2.0, %v1094_v20  ;;  %2485 = vrcp.f32 %v1064_v25 }
 0x40e   :  { %v2474_v44 = vpop.eup %2473  ;;  %v1113_v41 = vsub.f32 2.0, %v1097_v21  ;;  %2487 = vrcp.f32 %v1073_v26 }
 0x40f   :  { %v2476_v47 = vpop.eup %2475  ;;  %v1126_v27 = vmul.f32 %v2470_v35, %v1110_v43  ;;  %v1096_v37 = vmul.f32 %v2474_v44, %v1046_v49  ;;  %2346 = vmatprep.mubr.msk.f32.mxu1 %vm929_vm2, %v1140_v16 }
 0x410   :  { %v1099_v48 = vmul.f32 %v2476_v47, %v1055_v46  ;;  %v1070_v38 = vpop.xlane.xlu1 %1069  ;;  %2347 = vmatmul.mubr.msk.f32.vlgmr.msra.gmra.mxu1 %vm929_vm2, %v1141_v45  ;;  %v1129_v52 = vmul.f32 %v2472_v13, %v1113_v41 }
 0x411   :  { %v1142_v42 = vmul.f32 %v2954_v60, %v1126_v27  ;;  %v1112_v59 = vsub.f32 2.0, %v1096_v37  ;;  %2489 = vrcp.f32 %v1070_v38  ;;  %2357 = vmatpush3.msra.mxu1 %v2912_v1 }
 0x412   :  { %v2478_v51 = vpop.eup %2477  ;;  %v1115_v55 = vsub.f32 2.0, %v1099_v48  ;;  %2358 = vmatprep.subr.mxu1 %v2918_v2  ;;  %v1145_v49 = vmul.f32 %v2960_v5, %v1129_v52  ;;  %v1924_v52 = vld [vmem:[#allocation7 + $0x18] sm:$0xff] }
 0x413   :  { %v2480_v56 = vpop.eup %2479  ;;  %v1128_v7 = vmul.f32 %v2474_v44, %v1112_v59  ;;  %v1098_v40 = vmul.f32 %v2478_v51, %v1052_v0  ;;  %2359 = vmatpush3.msra.mxu1 %v2918_v2  ;;  %2353 = vmatprep.mubr.msk.f32.mxu0 %vm929_vm2, %v1142_v42  ;;  %v1928_v42 = vld [vmem:[#allocation7 + $0x38] sm:$0xff]  ;;  %v1927_v59 = vld [vmem:[#allocation7 + $0x30] sm:$0xff] }
 0x414   :  { %v1101_v57 = vmul.f32 %v2480_v56, %v1061_v63  ;;  %2370 = vmatprep.subr.mxu1 %v3009_v29  ;;  %2354 = vmatmul.mubr.msk.f32.vlgmr.msra.gmra.mxu0 %vm929_vm2, %v1143_v23  ;;  %v1131_v46 = vmul.f32 %v2476_v47, %v1115_v55  ;;  %v1764_v20 = vpop.permute.xlu1 %1763  ;;  %v1925_v23 = vld [vmem:[#allocation7 + $0x20] sm:$0xff]  ;;  %v1923_v55 = vld [vmem:[#allocation7 + $0x10] sm:$0xff] }
 0x415   :  { %v1144_v1 = vmul.f32 %v2966_v36, %v1128_v7  ;;  %v1114_v60 = vsub.f32 2.0, %v1098_v40  ;;  %2364 = vmatpush3.msra.mxu0 %v2968_v61  ;;  %v1921_v7 = vld [vmem:[#allocation7] sm:$0xff] }
 0x416   :  { %v2482_v50 = vpop.eup %2481  ;;  %v1117_v4 = vsub.f32 2.0, %v1101_v57  ;;  %2365 = vmatprep.subr.mxu0 %v3013_v18  ;;  %v1147_v32 = vmul.f32 %v2971_v58, %v1131_v46  ;;  %v1677_v58 = vpop.permute.xlu0 %1676 }
 0x417   :  { %v2484_v2 = vpop.eup %2483  ;;  %v1130_v62 = vmul.f32 %v2478_v51, %v1114_v60  ;;  %v1100_v0 = vmul.f32 %v2482_v50, %v1058_v53  ;;  %2366 = vmatpush3.msra.mxu0 %v3013_v18  ;;  %2360 = vmatprep.mubr.msk.f32.mxu1 %vm929_vm2, %v1144_v1  ;;  %v1926_v51 = vld [vmem:[#allocation7 + $0x28] sm:$0xff] }
 0x418   :  { %v1103_v63 = vmul.f32 %v2484_v2, %v1067_v33  ;;  %2377 = vmatprep.subr.mxu0 %v3017_v39  ;;  %2361 = vmatmul.mubr.msk.f32.vlgmr.msra.gmra.mxu1 %vm929_vm2, %v1145_v49  ;;  %v1133_v3 = vmul.f32 %v2480_v56, %v1117_v4  ;;  %v1922_v56 = vld [vmem:[#allocation7 + $0x8] sm:$0xff] }
 0x419   :  { %v1146_v36 = vmul.f32 %v2977_v8, %v1130_v62  ;;  %v1116_v61 = vsub.f32 2.0, %v1100_v0  ;;  %2371 = vmatpush3.msra.mxu1 %v3009_v29 }
 0x41a   :  { %v2486_v5 = vpop.eup %2485  ;;  %v1119_v54 = vsub.f32 2.0, %v1103_v63  ;;  %2372 = vmatprep.subr.mxu1 %v3011_v31  ;;  %v1149_v35 = vmul.f32 %v2979_v11, %v1133_v3 }
 0x41b   :  { %v2488_v18 = vpop.eup %2487  ;;  %v1132_v34 = vmul.f32 %v2482_v50, %v1116_v61  ;;  %v1102_v53 = vmul.f32 %v2486_v5, %v1064_v25  ;;  %2373 = vmatpush3.msra.mxu1 %v3011_v31  ;;  %2367 = vmatprep.mubr.msk.f32.mxu0 %vm929_vm2, %v1146_v36  ;;  %v2499_v36 = vld [vmem:[#allocation2 + $0x8] sm:$0xff]  ;;  %v2500_v61 = vld [vmem:[#allocation2] sm:$0xff] }
 0x41c   :  { %v1105_v33 = vmul.f32 %v2488_v18, %v1073_v26  ;;  %2384 = vmatprep.subr.mxu1 %v3015_v19  ;;  %2368 = vmatmul.mubr.msk.f32.vlgmr.msra.gmra.mxu0 %vm929_vm2, %v1147_v32  ;;  %v1135_v9 = vmul.f32 %v2484_v2, %v1119_v54 }
 0x41d   :  { %v1148_v8 = vmul.f32 %v2985_v15, %v1132_v34  ;;  %v1118_v29 = vsub.f32 2.0, %v1102_v53  ;;  %2378 = vmatpush3.msra.mxu0 %v3017_v39 }
 0x41e   :  { %v2490_v6 = vpop.eup %2489  ;;  %v1121_v10 = vsub.f32 2.0, %v1105_v33  ;;  %2379 = vmatprep.subr.mxu0 %v1677_v58  ;;  %v1151_v39 = vmul.f32 %v2987_v17, %v1135_v9 }
 0x41f   :  { %v1134_v31 = vmul.f32 %v2486_v5, %v1118_v29  ;;  %v1104_v13 = vmul.f32 %v2490_v6, %v1070_v38  ;;  %2380 = vmatpush3.msra.mxu0 %v1677_v58  ;;  %2374 = vmatprep.mubr.msk.f32.mxu1 %vm929_vm2, %v1148_v8 }
 0x420   :  { %2375 = vmatmul.mubr.msk.f32.vlgmr.msra.gmra.mxu1 %vm929_vm2, %v1149_v35  ;;  %v1137_v21 = vmul.f32 %v2488_v18, %v1121_v10  ;;  %2391 = vmatprep.subr.mxu0 %v1928_v42 }
 0x421   :  { %v1150_v14 = vmul.f32 %v2993_v22, %v1134_v31  ;;  %v1120_v15 = vsub.f32 2.0, %v1104_v13  ;;  %2385 = vmatpush3.msra.mxu1 %v3015_v19  ;;  %v79_v13 = vld [vmem:[#allocation8 + $0x21] ss:$0 sm:$0xff] }
 0x422   :  { %2386 = vmatprep.subr.mxu1 %v1764_v20  ;;  %v1153_v26 = vmul.f32 %v2995_v24, %v1137_v21 }
 0x423   :  { %v1136_v11 = vmul.f32 %v2490_v6, %v1120_v15  ;;  %2387 = vmatpush3.msra.mxu1 %v1764_v20  ;;  %2381 = vmatprep.mubr.msk.f32.mxu0 %vm929_vm2, %v1150_v14 }
 0x424   :  { %2382 = vmatmul.mubr.msk.f32.vlgmr.msra.gmra.mxu0 %vm929_vm2, %v1151_v39 }
 0x425   :  { %v1152_v25 = vmul.f32 %v3001_v28, %v1136_v11  ;;  %2392 = vmatpush3.msra.mxu0 %v1928_v42  ;;  %v2106_v42 = vsub.s32 4, %v2677_v12 }
 0x426   :  { %2393 = vmatprep.subr.mxu0 %v1927_v59 }
 0x427   :  { %2388 = vmatprep.mubr.msk.f32.mxu1 %vm929_vm2, %v1152_v25  ;;  %2394 = vmatpush3.msra.mxu0 %v1927_v59  ;;  %v80_v59 = vld [vmem:[#allocation8 + $0x20] sm:$0x3c] }
 0x428   :  { %2389 = vmatmul.mubr.msk.f32.vlgmr.msra.gmra.mxu1 %vm929_vm2, %v1153_v26  ;;  %2395 = vmatprep.subr.mxu0 %v1926_v51 }
 0x429   :  { %2396 = vmatpush3.msra.mxu0 %v1926_v51  ;;  %v2107_v51 = vrot.slane %v80_v59, %v2106_v42 }
 0x42a   :  { %2397 = vmatprep.subr.mxu0 %v1925_v23 }
 0x42b   :  { %2398 = vmatpush3.msra.mxu0 %v1925_v23 }
 0x42c   :  { %2399 = vmatprep.subr.mxu0 %v1924_v52 }
 0x42d   :  { %2400 = vmatpush3.msra.mxu0 %v1924_v52 }
 0x42e   :  { %2401 = vmatprep.subr.mxu0 %v1923_v55 }
 0x42f   :  { %2402 = vmatpush3.msra.mxu0 %v1923_v55 }
 0x430   :  { %2403 = vmatprep.subr.mxu0 %v1922_v56 }
 0x431   :  { %2404 = vmatpush3.msra.mxu0 %v1922_v56 }
 0x432   :  { %2405 = vmatprep.subr.mxu0 %v1921_v7 }
 0x433   :  { %2406 = vmatpush3.msra.mxu0 %v1921_v7 }
 0x483   :  { %v3069_v22 = vpop.f32.mrf.mxu1 }
 0x485   :  { %v3071_v19 = vpop.f32.mrf.mxu1 }
 0x4d0   :  { %v2348_v17 = vpop.f32.mrf.mxu1 }
 0x4d2   :  { %v1319_v16 = vpop.f32.mrf.mxu1 }
 0x4d4   :  { %v2355_v43 = vpop.f32.mrf.mxu0 }
 0x4d6   :  { %v1406_v45 = vpop.f32.mrf.mxu0 }
 0x4d8   :  { %v2362_v44 = vpop.f32.mrf.mxu1 }
 0x4da   :  { %v1493_v30 = vpop.f32.mrf.mxu1 }
 0x4dc   :  { %v2369_v41 = vpop.f32.mrf.mxu0 }
 0x4de   :  { %v1580_v28 = vpop.f32.mrf.mxu0 }
 0x4e0   :  { %v2376_v47 = vpop.f32.mrf.mxu1 }
 0x4e1   :  { %1885 = vrot.lane.b32.xlu1 %v2376_v47, %s2614_s26 }
 0x4e2   :  { %v1667_v24 = vpop.f32.mrf.mxu1 }
 0x4e3   :  { %1883 = vrot.lane.b32.xlu0 %v1667_v24, %s2614_s26 }
 0x4e4   :  { %v2383_v27 = vpop.f32.mrf.mxu0 }
 0x4e5   :  { %1893 = vrot.lane.b32.xlu1 %v2383_v27, %s2611_s19 }
 0x4e6   :  { %v1754_v37 = vpop.f32.mrf.mxu0 }
 0x4e7   :  { %1891 = vrot.lane.b32.xlu0 %v1754_v37, %s2611_s19 }
 0x4e8   :  { %v2390_v48 = vpop.f32.mrf.mxu1 }
 0x4e9   :  { %1901 = vrot.lane.b32.xlu1 %v2390_v48, %s2621_s12 }
 0x4ea   :  { %v1841_v38 = vpop.f32.mrf.mxu1 }
 0x4eb   :  { %1899 = vrot.lane.b32.xlu0 %v1841_v38, %s2621_s12 }
 0x4ed   :  { %1854 = vrot.lane.b32.xlu1 %v2348_v17, %s2614_s26 }
 0x4ef   :  { %1852 = vrot.lane.b32.xlu0 %v1319_v16, %s2614_s26 }
 0x4f1   :  { %1862 = vrot.lane.b32.xlu1 %v2355_v43, %s2611_s19 }
 0x4f3   :  { %1860 = vrot.lane.b32.xlu0 %v1406_v45, %s2611_s19 }
 0x4f5   :  { %1870 = vrot.lane.b32.xlu1 %v2362_v44, %s2621_s12 }
 0x4f7   :  { %1868 = vrot.lane.b32.xlu0 %v1493_v30, %s2621_s12 }
 0x553   :  { %v1886_v40 = vpop.permute.xlu1 %1885 }
 0x554   :  { %v1906_v50 = vsel %vm236_vm1, %v2369_v41, %v1886_v40 }
 0x555   :  { %v1884_v57 = vpop.permute.xlu0 %1883 }
 0x556   :  { %v1905_v4 = vsel %vm236_vm1, %v1580_v28, %v1884_v57 }
 0x557   :  { %v1894_v1 = vpop.permute.xlu1 %1893 }
 0x558   :  { %v1908_v49 = vsel %vm929_vm2, %v1906_v50, %v1894_v1 }
 0x559   :  { %v1892_v60 = vpop.permute.xlu0 %1891 }
 0x55a   :  { %v1907_v62 = vsel %vm929_vm2, %v1905_v4, %v1892_v60 }
 0x55b   :  { %v1902_v46 = vpop.permute.xlu1 %1901 }
 0x55c   :  { %v1910_v2 = vsel %vm1878_vm3, %v1908_v49, %v1902_v46 }
 0x55d   :  { %1915 = vrot.lane.b32.xlu1 %v1910_v2, %s2622_s13  ;;  %v1900_v0 = vpop.permute.xlu0 %1899 }
 0x55e   :  { %v1909_v63 = vsel %vm1878_vm3, %v1907_v62, %v1900_v0 }
 0x55f   :  { %1913 = vrot.lane.b32.xlu0 %v1909_v63, %s2622_s13  ;;  %v1855_v5 = vpop.permute.xlu1 %1854 }
 0x560   :  { %v1875_v33 = vsel %vm236_vm1, %v3069_v22, %v1855_v5 }
 0x561   :  { %2056 = vrot.lane.b32.xlu1 %v2499_v36, %s2622_s13  ;;  %v1853_v32 = vpop.permute.xlu0 %1852 }
 0x562   :  { %v1874_v53 = vsel %vm236_vm1, %v3071_v19, %v1853_v32 }
 0x563   :  { %2054 = vrot.lane.b32.xlu0 %v2500_v61, %s2622_s13  ;;  %v1863_v3 = vpop.permute.xlu1 %1862 }
 0x564   :  { %v1877_v58 = vsel %vm929_vm2, %v1875_v33, %v1863_v3 }
 0x565   :  { %v1861_v54 = vpop.permute.xlu0 %1860 }
 0x566   :  { %v1876_v8 = vsel %vm929_vm2, %v1874_v53, %v1861_v54 }
 0x567   :  { %v1871_v18 = vpop.permute.xlu1 %1870 }
 0x568   :  { %v1880_v9 = vsel %vm1878_vm3, %v1877_v58, %v1871_v18 }
 0x569   :  { %v1869_v34 = vpop.permute.xlu0 %1868 }
 0x56a   :  { %v1879_v6 = vsel %vm1878_vm3, %v1876_v8, %v1869_v34 }
 0x5cf   :  { %v1916_v29 = vpop.permute.xlu1 %1915 }
 0x5d0   :  { %v1920_v31 = vsel %vm100_vm0, %v1880_v9, %v1916_v29 }
 0x5d1   :  { %v1914_v35 = vpop.permute.xlu0 %1913 }
 0x5d2   :  { %v1919_v10 = vsel %vm100_vm0, %v1879_v6, %v1914_v35 }
 0x5d3   :  { %2407 = vmatprep.mubr.msk.f32.mxu0 %vm1929_vm4, %v1919_v10  ;;  %v2057_v15 = vpop.permute.xlu1 %2056  ;;  %v2042_v10 = vsub.s32 2, %v2677_v12 }
 0x5d4   :  { %2408 = vmatmul.mubr.msk.f32.vlgmr.msra.gmra.mxu0 %vm1929_vm4, %v1920_v31 }
 0x5d5   :  { %v2055_v21 = vpop.permute.xlu0 %2054 }
 0x694   :  { %v2409_v14 = vpop.f32.mrf.mxu0 }
 0x695   :  { %v2008_v20 = vadd.f32 %v2409_v14, %v79_v13  ;;  %v2043_v14 = vrot.slane %v80_v59, %v2042_v10 }
 0x696   :  { %v2002_v39 = vpop.f32.mrf.mxu0 }
 0x697   :  { %v2061_v11 = vadd.f32 %v2057_v15, %v2008_v20  ;;  %v2003_v25 = vadd.f32 %v2002_v39, %v79_v13  ;;  %v2012_v37 = vadd.f32 %v2499_v36, %v2008_v20  ;;  %v2050_v15 = vsub.s32 3, %v2677_v12 }
 0x699   :  { %v2060_v26 = vadd.f32 %v2055_v21, %v2003_v25  ;;  %2066 = vrot.lane.b32.xlu1 %v2061_v11, %s2623_s14  ;;  %v2011_v27 = vadd.f32 %v2500_v61, %v2003_v25  ;;  %v2016_v38 = vsel %vm100_vm0, %v2012_v37, 0.0  ;;  %v2051_v21 = vrot.slane %v80_v59, %v2050_v15 }
 0x69b   :  { %2064 = vrot.lane.b32.xlu0 %v2060_v26, %s2623_s14  ;;  %v2013_v48 = vsel %vm100_vm0, %v2011_v27, 0.0 }
 0x70b   :  { %v2067_v22 = vpop.permute.xlu1 %2066 }
 0x70c   :  { %v2073_v19 = vsel %vm100_vm0, %v2067_v22, 0.0 }
 0x70d   :  { %2074 = vadd.xlane.f32.xlu1 %v2073_v19  ;;  %v2065_v17 = vpop.permute.xlu0 %2064 }
 0x70e   :  { %v2070_v16 = vsel %vm100_vm0, %v2065_v17, 0.0 }
 0x70f   :  { %2071 = vadd.xlane.f32.xlu0 %v2070_v16 }
 0x796   :  { %v2075_v43 = vpop.xlane.xlu1 %2074 }
 0x797   :  { %v2077_v44 = vmul.f32 0.03125, %v2075_v43 }
 0x798   :  { %v2072_v45 = vpop.xlane.xlu0 %2071 }
 0x799   :  { %v2079_v30 = vsub.f32 %v2061_v11, %v2077_v44  ;;  %v2076_v41 = vmul.f32 0.03125, %v2072_v45  ;;  %v2126_v11 = vsub.s32 5, %v2677_v12 }
 0x79b   :  { %v2081_v47 = vmul.f32 %v2079_v30, %v2079_v30  ;;  %v2078_v28 = vsub.f32 %v2060_v26, %v2076_v41  ;;  %v2127_v22 = vrot.slane %v80_v59, %v2126_v11 }
 0x79d   :  { %v2080_v24 = vmul.f32 %v2078_v28, %v2078_v28  ;;  %2086 = vrot.lane.b32.xlu1 %v2081_v47, %s2623_s14 }
 0x79f   :  { %2084 = vrot.lane.b32.xlu0 %v2080_v24, %s2623_s14 }
 0x7be   :  { %2014 = vadd.xlane.f32.xlu0 %v2013_v48 }
 0x7c1   :  { %2017 = vadd.xlane.f32.xlu1 %v2016_v38 }
 0x7d2   :  { %2109 = vrot.lane.b32.xlu1 %v2107_v51, %s2622_s13 }
 0x80f   :  { %v2087_v55 = vpop.permute.xlu1 %2086 }
 0x810   :  { %v2093_v56 = vsel %vm100_vm0, %v2087_v55, 0.0 }
 0x811   :  { %v2085_v23 = vpop.permute.xlu0 %2084 }
 0x812   :  { %v2090_v52 = vsel %vm100_vm0, %v2085_v23, 0.0 }
 0x813   :  { %2091 = vadd.xlane.f32.xlu0 %v2090_v52 }
 0x817   :  { %2094 = vadd.xlane.f32.xlu0 %v2093_v56 }
 0x847   :  { %v2015_v7 = vpop.xlane.xlu0 %2014 }
 0x848   :  { %v2020_v40 = vmul.f32 0.03125, %v2015_v7 }
 0x84a   :  { %v2022_v57 = vsub.f32 %v2011_v27, %v2020_v40  ;;  %v2018_v1 = vpop.xlane.xlu1 %2017 }
 0x84b   :  { %v2021_v60 = vmul.f32 0.03125, %v2018_v1 }
 0x84c   :  { %v2024_v50 = vmul.f32 %v2022_v57, %v2022_v57 }
 0x84d   :  { %v2023_v49 = vsub.f32 %v2012_v37, %v2021_v60 }
 0x84e   :  { %v2026_v46 = vsel %vm100_vm0, %v2024_v50, 0.0  ;;  %v2110_v3 = vpop.permute.xlu1 %2109 }
 0x84f   :  { %2027 = vadd.xlane.f32.xlu0 %v2026_v46  ;;  %v2025_v4 = vmul.f32 %v2023_v49, %v2023_v49 }
 0x851   :  { %v2029_v2 = vsel %vm100_vm0, %v2025_v4, 0.0 }
 0x853   :  { %2030 = vadd.xlane.f32.xlu0 %v2029_v2 }
 0x89c   :  { %v2092_v62 = vpop.xlane.xlu0 %2091 }
 0x89d   :  { %v2096_v0 = vmul.f32 0.03125, %v2092_v62 }
 0x89f   :  { %v2098_v63 = vadd.f32 1e-12, %v2096_v0 }
 0x8a0   :  { %v2095_v36 = vpop.xlane.xlu0 %2094 }
 0x8a1   :  { %2491 = vrsqrt.f32 %v2098_v63  ;;  %v2097_v61 = vmul.f32 0.03125, %v2095_v36 }
 0x8a3   :  { %v2099_v5 = vadd.f32 1e-12, %v2097_v61 }
 0x8a5   :  { %2493 = vrsqrt.f32 %v2099_v5 }
 0x8ae   :  { %v2492_v32 = vpop.eup %2491 }
 0x8af   :  { %v2102_v54 = vmul.f32 %v2492_v32, %v2078_v28 }
 0x8b1   :  { %v2112_v18 = vmul.f32 %v2110_v3, %v2102_v54 }
 0x8b2   :  { %v2494_v34 = vpop.eup %2493 }
 0x8b3   :  { %v2103_v53 = vmul.f32 %v2494_v34, %v2079_v30  ;;  %2116 = vrot.lane.b32.xlu0 %v2112_v18, %s2623_s14 }
 0x8b5   :  { %v2113_v33 = vmul.f32 %v2110_v3, %v2103_v53 }
 0x8b7   :  { %2118 = vrot.lane.b32.xlu1 %v2113_v33, %s2623_s14 }
 0x8d8   :  { %v2028_v8 = vpop.xlane.xlu0 %2027 }
 0x8d9   :  { %v2032_v29 = vmul.f32 0.03125, %v2028_v8 }
 0x8db   :  { %v2034_v6 = vadd.f32 1e-12, %v2032_v29 }
 0x8dc   :  { %v2031_v58 = vpop.xlane.xlu0 %2030 }
 0x8dd   :  { %v2033_v35 = vmul.f32 0.03125, %v2031_v58  ;;  %2495 = vrsqrt.f32 %v2034_v6 }
 0x8df   :  { %v2035_v9 = vadd.f32 1e-12, %v2033_v35 }
 0x8e1   :  { %2497 = vrsqrt.f32 %v2035_v9 }
 0x8ea   :  { %v2496_v31 = vpop.eup %2495 }
 0x8eb   :  { %v2038_v13 = vmul.f32 %v2496_v31, %v2022_v57 }
 0x8ed   :  { %v2044_v39 = vmul.f32 %v2043_v14, %v2038_v13 }
 0x8ee   :  { %v2498_v20 = vpop.eup %2497 }
 0x8ef   :  { %v2039_v25 = vmul.f32 %v2498_v20, %v2023_v49  ;;  %v2052_v26 = vadd.f32 %v2051_v21, %v2044_v39 }
 0x8f1   :  { %v2045_v19 = vmul.f32 %v2043_v14, %v2039_v25 }
 0x8f3   :  { %v2053_v44 = vadd.f32 %v2051_v21, %v2045_v19 }
 0x925   :  { %v2117_v17 = vpop.permute.xlu0 %2116 }
 0x926   :  { %v2122_v16 = vadd.f32 %v2117_v17, %v2052_v26 }
 0x928   :  { %v2128_v43 = vadd.f32 %v2127_v22, %v2122_v16 }
 0x929   :  { %v2119_v45 = vpop.permute.xlu1 %2118 }
 0x92a   :  { %v2130_v30 = vmax.f32 %v2128_v43, 0.0  ;;  %v2123_v41 = vadd.f32 %v2119_v45, %v2053_v44 }
 0x92c   :  { %2132 = vst.msk [vmem:[#allocation10] sm:$0xff] %vm100_vm0, %v2130_v30  ;;  %v2129_v47 = vadd.f32 %v2127_v22, %v2123_v41 }
 0x92e   :  { %v2131_v28 = vmax.f32 %v2129_v47, 0.0 }
 0x930   :  { %2133 = vst.msk [vmem:[#allocation10 + $0x8] sm:$0xff] %vm100_vm0, %v2131_v28 }
 0x931   :  { %2592 = shalt.err (!%p2589_p10)
}
 0x932   :  { %2145 = dma.vmem_to_hbm [thread:$0]  %s2140_s17, 256, %s3136_s4, [#allocation4], %s2613_s25, %s2613_s25, %s2614_s26  }
 0x933   :  { %2607 = dma.done.wait [#allocation4], 256  }
 0x934   :  { %2608 = vsyncadd [#allocation4], 4294967040 }
 0x935   :  { %2149 = vsyncpa [#allocation3], 1 }
 0x936   :  { %2150 = vsyncpa [#allocation6], 1 }
 0x937   :  { %2151 = vsyncpa [#allocation9], 1 }
 0x938   :  { %2152 = vsyncpa [#allocation4], 1 }

</bundles_post_ra>
